<compile_context>
chip_gen: v7x
topology: tpu7x:2x2x1
jax: 0.10.0
libtpu: 0.0.40
codegen_flags: <defaults>
</compile_context>

<pallas_src>
import functools

import jax
import jax.numpy as jnp
from jax.experimental import pallas as pl
from jax.experimental.pallas import tpu as pltpu


# ----------------------------------------------------------------------------
# Fused kernel: 1x1 conv + BN1 + ReLU -> 3x3 conv + BN2 [-> +residual] -> ReLU
# ----------------------------------------------------------------------------
def _bottleneck_fused_kernel(x_ref, w1_ref, b1_ref, w2p_ref, b2_ref, o_ref, *,
                             H, W, Cin, Chid, Cout, add_residual):
    # ---- 1x1 conv + folded BN1 + ReLU; hidden activation stays in VMEM ----
    x = x_ref[0]                                            # (H, W, Cin)
    t = jnp.dot(x.reshape(H * W, Cin), w1_ref[...],
                preferred_element_type=jnp.float32)         # (H*W, Chid)
    t = jnp.maximum(t + b1_ref[...], 0.0)

    # ---- build zero-halo, dx-packed slab in registers (no HBM pad) ----
    t3 = t.reshape(H, W, Chid)
    zc = jnp.zeros((H, 1, Chid), jnp.float32)
    tw = jnp.concatenate([zc, t3, zc], axis=1)              # (H, W+2, Chid)
    slab = jnp.concatenate(                                 # (H, W, 3*Chid)
        [tw[:, 0:W, :], tw[:, 1:W + 1, :], tw[:, 2:W + 2, :]], axis=-1)
    zr = jnp.zeros((1, W, 3 * Chid), jnp.float32)
    slab = jnp.concatenate([zr, slab, zr], axis=0)          # (H+2, W, 3*Chid)
    slab = slab.reshape((H + 2) * W, 3 * Chid)

    # ---- 3x3 conv as 3 dy-slab matmuls, K = 3*Chid (statically unrolled) ----
    acc = jnp.zeros((H * W, Cout), jnp.float32)
    for dy in range(3):
        acc = acc + jnp.dot(slab[dy * W:(dy + H) * W, :], w2p_ref[dy],
                            preferred_element_type=jnp.float32)
    acc = acc + b2_ref[...]                                 # folded BN2 bias

    if add_residual:                                        # static python flag
        acc = acc + x.reshape(H * W, Cout)
    acc = jnp.maximum(acc, 0.0)
    o_ref[0] = acc.reshape(H, W, Cout).astype(o_ref.dtype)


# ----------------------------------------------------------------------------
# Host-side wrapper: BN folding, weight packing, pallas_call
# ----------------------------------------------------------------------------
def _bn_fold(gamma, beta, mean, var, eps=1e-5):
    s = gamma * jax.lax.rsqrt(var + eps)
    return s, beta - mean * s


def bottleneck_forward(x_nchw, params, *, in_channels, out_channels,
                       shortcut=True, g=1, e=0.5, eps=1e-5):
    # TODO(synk): grouped 3x3 conv (g > 1) not implemented; only the g=1 default path.
    if g != 1:
        raise NotImplementedError("grouped conv (g > 1) not implemented")

    c_hid = int(out_channels * e)
    N, C, H, W = x_nchw.shape
    assert C == in_channels

    x = jnp.transpose(x_nchw, (0, 2, 3, 1))                 # NCHW -> NHWC

    # Fold BN (inference mode) into the conv weights / biases.
    s1, b1 = _bn_fold(*params["bn1"], eps)
    w1 = params["conv1_w"][:, :, 0, 0].T * s1[None, :]      # (Cin, Chid)
    s2, b2 = _bn_fold(*params["bn2"], eps)
    w2 = jnp.transpose(params["conv2_w"], (2, 3, 1, 0)) * s2  # (3, 3, Chid, Cout)
    w2p = w2.reshape(3, 3 * c_hid, out_channels)            # dx taps packed into K

    add_res = bool(shortcut and in_channels == out_channels)

    kernel = functools.partial(_bottleneck_fused_kernel, H=H, W=W, Cin=C,
                               Chid=c_hid, Cout=out_channels,
                               add_residual=add_res)
    out = pl.pallas_call(
        kernel,
        out_shape=jax.ShapeDtypeStruct((N, H, W, out_channels), x.dtype),
        grid=(N,),
        in_specs=[
            pl.BlockSpec((1, H, W, C), lambda n: (n, 0, 0, 0)),
            pl.BlockSpec((C, c_hid), lambda n: (0, 0)),            # VMEM-resident
            pl.BlockSpec((1, c_hid), lambda n: (0, 0)),
            pl.BlockSpec((3, 3 * c_hid, out_channels), lambda n: (0, 0, 0)),
            pl.BlockSpec((1, out_channels), lambda n: (0, 0)),
        ],
        out_specs=pl.BlockSpec((1, H, W, out_channels), lambda n: (n, 0, 0, 0)),
        compiler_params=pltpu.CompilerParams(dimension_semantics=("parallel",)),
    )(x, w1, b1.reshape(1, c_hid), w2p, b2.reshape(1, out_channels))

    return jnp.transpose(out, (0, 3, 1, 2))                 # NHWC -> NCHW


# ----------------------------------------------------------------------------
# Deterministic synthetic parameters + pure-JAX reference (for verification)
# ----------------------------------------------------------------------------
def init_params(key, in_channels, out_channels, e=0.5):
    c_hid = int(out_channels * e)
    k1, k2, k3, k4 = jax.random.split(key, 4)

    def bn(k, c):
        ka, kb, kc, kd = jax.random.split(k, 4)
        gamma = 1.0 + 0.1 * jax.random.normal(ka, (c,), jnp.float32)
        beta = 0.1 * jax.random.normal(kb, (c,), jnp.float32)
        mean = 0.1 * jax.random.normal(kc, (c,), jnp.float32)
        var = jax.random.uniform(kd, (c,), jnp.float32, 0.5, 1.5)
        return gamma, beta, mean, var

    return {
        "conv1_w": 0.1 * jax.random.normal(k1, (c_hid, in_channels, 1, 1), jnp.float32),
        "bn1": bn(k2, c_hid),
        "conv2_w": 0.1 * jax.random.normal(k3, (out_channels, c_hid, 3, 3), jnp.float32),
        "bn2": bn(k4, out_channels),
    }


def bottleneck_reference(x, params, *, in_channels, out_channels,
                         shortcut=True, e=0.5, eps=1e-5):
    def bn(y, p):
        gamma, beta, mean, var = p
        inv = gamma / jnp.sqrt(var + eps)
        return (y * inv[None, :, None, None]
                + (beta - mean * inv)[None, :, None, None])

    dn = ("NCHW", "OIHW", "NCHW")
    hi = jax.lax.Precision.HIGHEST
    y = jax.lax.conv_general_dilated(x, params["conv1_w"], (1, 1), "VALID",
                                     dimension_numbers=dn, precision=hi)
    y = jnp.maximum(bn(y, params["bn1"]), 0.0)
    y = jax.lax.conv_general_dilated(y, params["conv2_w"], (1, 1),
                                     ((1, 1), (1, 1)),
                                     dimension_numbers=dn, precision=hi)
    y = bn(y, params["bn2"])
    if shortcut and in_channels == out_channels:
        y = y + x
    return jnp.maximum(y, 0.0)


# ----------------------------------------------------------------------------
if __name__ == "__main__":
    key = jax.random.PRNGKey(0)
    kx, kp = jax.random.split(key)

    N, C, H, W = 2, 4, 16, 16          # in_channels == out_channels -> residual path
    x = jax.random.normal(kx, (N, C, H, W), jnp.float32)
    params = init_params(kp, in_channels=C, out_channels=C, e=0.5)

    out = bottleneck_forward(x, params, in_channels=C, out_channels=C,
                             shortcut=True, g=1, e=0.5)
    out = jax.block_until_ready(out)
    assert out.shape == (N, C, H, W), out.shape

    ref = bottleneck_reference(x, params, in_channels=C, out_channels=C,
                               shortcut=True, e=0.5)
    err = float(jnp.max(jnp.abs(out - ref)))
    assert err < 2e-2, f"kernel/reference mismatch: max abs err = {err}"

    print("KERNEL_OK")
</pallas_src>

<mosaic_0001>
module attributes {stable_mosaic.version = 11 : i64} {
  func.func @_bottleneck_fused_kernel(%arg0: i32, %arg1: memref<1x16x16x4xf32, #tpu.memory_space<vmem>>, %arg2: memref<4x2xf32, #tpu.memory_space<vmem>>, %arg3: memref<1x2xf32, #tpu.memory_space<vmem>>, %arg4: memref<3x6x4xf32, #tpu.memory_space<vmem>>, %arg5: memref<1x4xf32, #tpu.memory_space<vmem>>, %arg6: memref<1x16x16x4xf32, #tpu.memory_space<vmem>>) attributes {dimension_semantics = [#tpu.dimension_semantics<parallel>], iteration_bounds = array<i64: 2>, scalar_prefetch = 0 : i64, scratch_operands = 0 : i64, tpu.core_type = #tpu.core_type<tc>, window_params = [{transform_indices = @transform_0, window_bounds = array<i64: 1, 16, 16, 4>}, {pipeline_mode = #tpu.pipeline_mode<synchronous>, transform_indices = @transform_1, window_bounds = array<i64: 4, 2>}, {pipeline_mode = #tpu.pipeline_mode<synchronous>, transform_indices = @transform_2, window_bounds = array<i64: 1, 2>}, {pipeline_mode = #tpu.pipeline_mode<synchronous>, transform_indices = @transform_3, window_bounds = array<i64: 3, 6, 4>}, {pipeline_mode = #tpu.pipeline_mode<synchronous>, transform_indices = @transform_4, window_bounds = array<i64: 1, 4>}, {transform_indices = @transform_5, window_bounds = array<i64: 1, 16, 16, 4>}]} {
    %c0 = arith.constant 0 : index
    %c0_0 = arith.constant 0 : index
    %c0_1 = arith.constant 0 : index
    %c0_2 = arith.constant 0 : index
    %0 = vector.load %arg1[%c0, %c0_0, %c0_1, %c0_2] : memref<1x16x16x4xf32, #tpu.memory_space<vmem>>, vector<1x16x16x4xf32>
    %1 = vector.shape_cast %0 : vector<1x16x16x4xf32> to vector<16x16x4xf32>
    %2 = vector.shape_cast %1 : vector<16x16x4xf32> to vector<256x4xf32>
    %c0_3 = arith.constant 0 : index
    %c0_4 = arith.constant 0 : index
    %3 = vector.load %arg2[%c0_3, %c0_4] : memref<4x2xf32, #tpu.memory_space<vmem>>, vector<4x2xf32>
    %cst = arith.constant dense<0.000000e+00> : vector<256x2xf32>
    %4 = tpu.matmul %2, %3, %cst {dimension_numbers = #tpu.dot_dimension_numbers<[1], [0], [0], [1], [0, 0, 1, 1], [], []>} : vector<256x4xf32>, vector<4x2xf32>, vector<256x2xf32> -> vector<256x2xf32>
    %c0_5 = arith.constant 0 : index
    %c0_6 = arith.constant 0 : index
    %5 = vector.load %arg3[%c0_5, %c0_6] : memref<1x2xf32, #tpu.memory_space<vmem>>, vector<1x2xf32>
    %6 = vector.broadcast %5 : vector<1x2xf32> to vector<256x2xf32>
    %7 = arith.addf %4, %6 : vector<256x2xf32>
    %cst_7 = arith.constant 0.000000e+00 : f32
    %8 = vector.broadcast %cst_7 : f32 to vector<256x2xf32>
    %9 = arith.maximumf %7, %8 : vector<256x2xf32>
    %10 = vector.shape_cast %9 : vector<256x2xf32> to vector<16x16x2xf32>
    %cst_8 = arith.constant 0.000000e+00 : f32
    %11 = vector.broadcast %cst_8 : f32 to vector<16x1x2xf32>
    %12 = tpu.concatenate %11, %10, %11 in 1 : vector<16x1x2xf32>, vector<16x16x2xf32>, vector<16x1x2xf32> -> vector<16x18x2xf32>
    %13 = vector.extract_strided_slice %12 {offsets = [0, 0, 0], sizes = [16, 16, 2], strides = [1, 1, 1]} : vector<16x18x2xf32> to vector<16x16x2xf32>
    %14 = vector.extract_strided_slice %12 {offsets = [0, 1, 0], sizes = [16, 16, 2], strides = [1, 1, 1]} : vector<16x18x2xf32> to vector<16x16x2xf32>
    %15 = vector.extract_strided_slice %12 {offsets = [0, 2, 0], sizes = [16, 16, 2], strides = [1, 1, 1]} : vector<16x18x2xf32> to vector<16x16x2xf32>
    %16 = tpu.concatenate %13, %14, %15 in 2 : vector<16x16x2xf32>, vector<16x16x2xf32>, vector<16x16x2xf32> -> vector<16x16x6xf32>
    %cst_9 = arith.constant 0.000000e+00 : f32
    %17 = vector.broadcast %cst_9 : f32 to vector<1x16x6xf32>
    %18 = tpu.concatenate %17, %16, %17 in 0 : vector<1x16x6xf32>, vector<16x16x6xf32>, vector<1x16x6xf32> -> vector<18x16x6xf32>
    %19 = vector.shape_cast %18 : vector<18x16x6xf32> to vector<288x6xf32>
    %cst_10 = arith.constant 0.000000e+00 : f32
    %20 = vector.broadcast %cst_10 : f32 to vector<256x4xf32>
    %21 = vector.extract_strided_slice %19 {offsets = [0, 0], sizes = [256, 6], strides = [1, 1]} : vector<288x6xf32> to vector<256x6xf32>
    %c0_11 = arith.constant 0 : index
    %c0_12 = arith.constant 0 : index
    %c0_13 = arith.constant 0 : index
    %22 = vector.load %arg4[%c0_11, %c0_12, %c0_13] : memref<3x6x4xf32, #tpu.memory_space<vmem>>, vector<1x6x4xf32>
    %23 = vector.shape_cast %22 : vector<1x6x4xf32> to vector<6x4xf32>
    %cst_14 = arith.constant dense<0.000000e+00> : vector<256x4xf32>
    %24 = tpu.matmul %21, %23, %cst_14 {dimension_numbers = #tpu.dot_dimension_numbers<[1], [0], [0], [1], [0, 0, 1, 1], [], []>} : vector<256x6xf32>, vector<6x4xf32>, vector<256x4xf32> -> vector<256x4xf32>
    %25 = arith.addf %20, %24 : vector<256x4xf32>
    %26 = vector.extract_strided_slice %19 {offsets = [16, 0], sizes = [256, 6], strides = [1, 1]} : vector<288x6xf32> to vector<256x6xf32>
    %c1 = arith.constant 1 : index
    %c0_15 = arith.constant 0 : index
    %c0_16 = arith.constant 0 : index
    %27 = vector.load %arg4[%c1, %c0_15, %c0_16] : memref<3x6x4xf32, #tpu.memory_space<vmem>>, vector<1x6x4xf32>
    %28 = vector.shape_cast %27 : vector<1x6x4xf32> to vector<6x4xf32>
    %cst_17 = arith.constant dense<0.000000e+00> : vector<256x4xf32>
    %29 = tpu.matmul %26, %28, %cst_17 {dimension_numbers = #tpu.dot_dimension_numbers<[1], [0], [0], [1], [0, 0, 1, 1], [], []>} : vector<256x6xf32>, vector<6x4xf32>, vector<256x4xf32> -> vector<256x4xf32>
    %30 = arith.addf %25, %29 : vector<256x4xf32>
    %31 = vector.extract_strided_slice %19 {offsets = [32, 0], sizes = [256, 6], strides = [1, 1]} : vector<288x6xf32> to vector<256x6xf32>
    %c2 = arith.constant 2 : index
    %c0_18 = arith.constant 0 : index
    %c0_19 = arith.constant 0 : index
    %32 = vector.load %arg4[%c2, %c0_18, %c0_19] : memref<3x6x4xf32, #tpu.memory_space<vmem>>, vector<1x6x4xf32>
    %33 = vector.shape_cast %32 : vector<1x6x4xf32> to vector<6x4xf32>
    %cst_20 = arith.constant dense<0.000000e+00> : vector<256x4xf32>
    %34 = tpu.matmul %31, %33, %cst_20 {dimension_numbers = #tpu.dot_dimension_numbers<[1], [0], [0], [1], [0, 0, 1, 1], [], []>} : vector<256x6xf32>, vector<6x4xf32>, vector<256x4xf32> -> vector<256x4xf32>
    %35 = arith.addf %30, %34 : vector<256x4xf32>
    %c0_21 = arith.constant 0 : index
    %c0_22 = arith.constant 0 : index
    %36 = vector.load %arg5[%c0_21, %c0_22] : memref<1x4xf32, #tpu.memory_space<vmem>>, vector<1x4xf32>
    %37 = vector.broadcast %36 : vector<1x4xf32> to vector<256x4xf32>
    %38 = arith.addf %35, %37 : vector<256x4xf32>
    %39 = vector.shape_cast %1 : vector<16x16x4xf32> to vector<256x4xf32>
    %40 = arith.addf %38, %39 : vector<256x4xf32>
    %cst_23 = arith.constant 0.000000e+00 : f32
    %41 = vector.broadcast %cst_23 : f32 to vector<256x4xf32>
    %42 = arith.maximumf %40, %41 : vector<256x4xf32>
    %43 = vector.shape_cast %42 : vector<256x4xf32> to vector<16x16x4xf32>
    %c0_24 = arith.constant 0 : index
    %c0_25 = arith.constant 0 : index
    %c0_26 = arith.constant 0 : index
    %c0_27 = arith.constant 0 : index
    %44 = vector.load %arg6[%c0_24, %c0_25, %c0_26, %c0_27] : memref<1x16x16x4xf32, #tpu.memory_space<vmem>>, vector<1x16x16x4xf32>
    %45 = vector.shape_cast %44 : vector<1x16x16x4xf32> to vector<16x16x4xf32>
    %46 = vector.shape_cast %43 : vector<16x16x4xf32> to vector<1x16x16x4xf32>
    tpu.vector_store %arg6[%c0_24, %c0_25, %c0_26, %c0_27], %46 {strides = array<i32>} : memref<1x16x16x4xf32, #tpu.memory_space<vmem>>, vector<1x16x16x4xf32>,
    return
  }
  func.func @transform_0(%arg0: i32) -> (i32, i32, i32, i32) {
    %c0_i32 = arith.constant 0 : i32
    %c0_i32_0 = arith.constant 0 : i32
    %c0_i32_1 = arith.constant 0 : i32
    %c0_i32_2 = arith.constant 0 : i32
    return %arg0, %c0_i32, %c0_i32_0, %c0_i32_1 : i32, i32, i32, i32
  }
  func.func @transform_1(%arg0: i32) -> (i32, i32) {
    %c0_i32 = arith.constant 0 : i32
    %c0_i32_0 = arith.constant 0 : i32
    %c0_i32_1 = arith.constant 0 : i32
    return %c0_i32, %c0_i32_0 : i32, i32
  }
  func.func @transform_2(%arg0: i32) -> (i32, i32) {
    %c0_i32 = arith.constant 0 : i32
    %c0_i32_0 = arith.constant 0 : i32
    %c0_i32_1 = arith.constant 0 : i32
    return %c0_i32, %c0_i32_0 : i32, i32
  }
  func.func @transform_3(%arg0: i32) -> (i32, i32, i32) {
    %c0_i32 = arith.constant 0 : i32
    %c0_i32_0 = arith.constant 0 : i32
    %c0_i32_1 = arith.constant 0 : i32
    %c0_i32_2 = arith.constant 0 : i32
    return %c0_i32, %c0_i32_0, %c0_i32_1 : i32, i32, i32
  }
  func.func @transform_4(%arg0: i32) -> (i32, i32) {
    %c0_i32 = arith.constant 0 : i32
    %c0_i32_0 = arith.constant 0 : i32
    %c0_i32_1 = arith.constant 0 : i32
    return %c0_i32, %c0_i32_0 : i32, i32
  }
  func.func @transform_5(%arg0: i32) -> (i32, i32, i32, i32) {
    %c0_i32 = arith.constant 0 : i32
    %c0_i32_0 = arith.constant 0 : i32
    %c0_i32_1 = arith.constant 0 : i32
    %c0_i32_2 = arith.constant 0 : i32
    return %arg0, %c0_i32, %c0_i32_0, %c0_i32_1 : i32, i32, i32, i32
  }
}

</mosaic_0001>

<bundles_post_ra>
// kernel: tpu_custom_call.1
= control target key start
LH: loop header
LB: loop body
LE: loop exit
PB: predicated region body
PF: predicated region fallthrough
CT: control target
= control target key end

     0   :  { %s2871_s18 = smov 0   ;;  %s3920_s0 = inlined_call_operand.vmem [shape: f32[2,16,16,4], index: 0, kind: input, shape index: {}]   ;;  %s3921_s1 = inlined_call_operand.vmem [shape: f32[4,2], index: 1, kind: input, shape index: {}]   ;;  %s3922_s2 = inlined_call_operand.vmem [shape: f32[1,2], index: 2, kind: input, shape index: {}]   ;;  %s3923_s3 = inlined_call_operand.vmem [shape: f32[3,6,4], index: 3, kind: input, shape index: {}]   ;;  %s3924_s4 = inlined_call_operand.vmem [shape: f32[1,4], index: 4, kind: input, shape index: {}]   ;;  %s3925_s5 = inlined_call_operand.vmem [shape: f32[2,16,16,4], index: 5, kind: output, shape index: {}]  }
   0x1 LB: > { %s2246_s19 = sadd.s32 4294967295, %s2836_s18   ;;  %p2250_p0 = scmp.ge.s32.totalorder %s2836_s18, 1  ;;  %s2836_s18 = sphi %s2871_s18, %s15_s18  }
   0x2   : > { %p187_p1 = scmp.lt.s32.totalorder %s2836_s18, 3 }
   0x4   : > { %p188_p2 = pnand %p2250_p0, %p187_p1 }
   0x5   : > { %v257_v0 = vld [vmem:[%s3921_s1] sm:$0xf] (!%p188_p2)  ;;  %vm362_vm0 = vcmask (!%p188_p2), 1043456   ;;  %p215_p3 = scmp.lt.s32.totalorder (!%p188_p2), %s2246_s19, 1  ;;  %vm265_vm1 = vcmask (!%p188_p2), 31744   ;;  %vm993_vm2 = vcmask (!%p188_p2), 1045504  }
   0x6   : > { %191 = sbr.rel (%p188_p2) target bundleno = 761 (0x2f9), region = 40  ;;  %2523 = vmatprep.subr.msk.mxu0 (!%p188_p2), %vm362_vm0, %v257_v0  ;;  %v1235_v33 = vld [vmem:[%s3923_s3] sm:$0x3f] (!%p188_p2)  ;;  %v2838_v38 = vmov (!%p188_p2), 0.0   ;;  %v2289_v43 = vld [vmem:[%s3923_s3 + $0x8] sm:$0x3f] (!%p188_p2) }
   0x7   : > { %2524 = vmatpush3.msk.msra.mxu0 (!%p188_p2), %vm362_vm0, %v257_v0  ;;  %v2962_v34 = vld [vmem:[%s3922_s2] ss:$0 sm:$0xff] (!%p188_p2)  ;;  %2623 = vmatprep.subr.msk.mxu1 (!%p188_p2), %vm993_vm2, %v1235_v33  ;;  %vm655_vm3 = vcmask (!%p188_p2), 1040384   ;;  %vm816_vm4 = vcmask (!%p188_p2), 1046528   ;;  %s2839_s7 = smov (!%p188_p2), 4   ;;  %s2840_s8 = smov (!%p188_p2), 2  }
   0x8   : > { %2624 = vmatpush3.msk.msra.mxu1 (!%p188_p2), %vm993_vm2, %v1235_v33  ;;  %2625 = vmatprep.mubr.f32.mxu1 (!%p188_p2), %v2838_v38  ;;  %vm1170_vm5 = vcmask (!%p188_p2), 15360   ;;  %vm1238_vm6 = vcmask (!%p188_p2), 48128  }
   0x9   : > { %2626 = vmatmul.mubr.f32.vlgmr.msra.gmra.mrb[0].mxu1 (!%p188_p2), %v2838_v38  ;;  %2573 = vmatprep.subr.msk.mxu0 (!%p188_p2), %vm993_vm2, %v2289_v43 }
   0xd   : > { %s3927_s19 = smov (!%p215_p3, %s2246_s19), 1 }
   0xe   : > { %s2389_s22 = sshll.u32 %s3927_s19, 8 }
   0xf   : > { %s2890_s25 = scalar_lea.vmem %s3920_s0, %s2389_s22  ;;  %s3764_s15 = scalar_lea.vmem %s3925_s5, %s2389_s22 }
  0x10   : > { %v225_v1 = vld [vmem:[%s2890_s25] sm:$0xff]  ;;  %v226_v2 = vld [vmem:[%s2890_s25 + $0x8] sm:$0xff]  ;;  %v227_v3 = vld [vmem:[%s2890_s25 + $0x10] sm:$0xff] }
  0x11   : > { %2525 = vmatprep.mubr.msk.f32.mxu0 %vm265_vm1, %v225_v1  ;;  %v228_v4 = vld [vmem:[%s2890_s25 + $0x18] sm:$0xff]  ;;  %v229_v5 = vld [vmem:[%s2890_s25 + $0x20] sm:$0xff]  ;;  %v230_v6 = vld [vmem:[%s2890_s25 + $0x28] sm:$0xff] }
  0x12   : > { %2526 = vmatmul.mubr.msk.f32.vlgmr.msra.gmra.mrb[0].mxu0 %vm265_vm1, %v226_v2  ;;  %v231_v7 = vld [vmem:[%s2890_s25 + $0x30] sm:$0xff]  ;;  %v232_v8 = vld [vmem:[%s2890_s25 + $0x38] sm:$0xff]  ;;  %v233_v9 = vld [vmem:[%s2890_s25 + $0x40] sm:$0xff] }
  0x13   : > { %2528 = vmatprep.mubr.msk.f32.mxu0 %vm265_vm1, %v227_v3  ;;  %v234_v10 = vld [vmem:[%s2890_s25 + $0x48] sm:$0xff]  ;;  %v235_v11 = vld [vmem:[%s2890_s25 + $0x50] sm:$0xff]  ;;  %v236_v12 = vld [vmem:[%s2890_s25 + $0x58] sm:$0xff]  ;;  %2574 = vmatpush3.msk.msra.mxu0 %vm993_vm2, %v2289_v43 }
  0x14   : > { %v237_v13 = vld [vmem:[%s2890_s25 + $0x60] sm:$0xff]  ;;  %v238_v14 = vld [vmem:[%s2890_s25 + $0x68] sm:$0xff]  ;;  %v239_v15 = vld [vmem:[%s2890_s25 + $0x70] sm:$0xff] }
  0x15   : > { %v240_v16 = vld [vmem:[%s2890_s25 + $0x78] sm:$0xff]  ;;  %v241_v17 = vld [vmem:[%s2890_s25 + $0x80] sm:$0xff]  ;;  %v242_v18 = vld [vmem:[%s2890_s25 + $0x88] sm:$0xff] }
  0x16   : > { %2529 = vmatmul.mubr.msk.f32.gmra.mrb[2].mxu0 %vm265_vm1, %v228_v4  ;;  %v243_v19 = vld [vmem:[%s2890_s25 + $0x90] sm:$0xff]  ;;  %v244_v20 = vld [vmem:[%s2890_s25 + $0x98] sm:$0xff]  ;;  %v245_v21 = vld [vmem:[%s2890_s25 + $0xa0] sm:$0xff] }
  0x17   : > { %2531 = vmatprep.mubr.msk.f32.mxu0 %vm265_vm1, %v229_v5  ;;  %v246_v22 = vld [vmem:[%s2890_s25 + $0xa8] sm:$0xff]  ;;  %v247_v23 = vld [vmem:[%s2890_s25 + $0xb0] sm:$0xff]  ;;  %v248_v24 = vld [vmem:[%s2890_s25 + $0xb8] sm:$0xff] }
  0x18   : > { %v249_v25 = vld [vmem:[%s2890_s25 + $0xc0] sm:$0xff]  ;;  %v250_v26 = vld [vmem:[%s2890_s25 + $0xc8] sm:$0xff]  ;;  %v251_v27 = vld [vmem:[%s2890_s25 + $0xd0] sm:$0xff] }
  0x19   : > { %v252_v28 = vld [vmem:[%s2890_s25 + $0xd8] sm:$0xff]  ;;  %v253_v29 = vld [vmem:[%s2890_s25 + $0xe0] sm:$0xff]  ;;  %v254_v30 = vld [vmem:[%s2890_s25 + $0xe8] sm:$0xff] }
  0x1a   : > { %2532 = vmatmul.mubr.msk.f32.gmra.mrb[4].mxu0 %vm265_vm1, %v230_v6  ;;  %v255_v31 = vld [vmem:[%s2890_s25 + $0xf0] sm:$0xff]  ;;  %v256_v32 = vld [vmem:[%s2890_s25 + $0xf8] sm:$0xff] }
  0x1b   : > { %2534 = vmatprep.mubr.msk.f32.mxu0 %vm265_vm1, %v231_v7 }
  0x1e   : > { %2535 = vmatmul.mubr.msk.f32.gmra.mrb[6].mxu0 %vm265_vm1, %v232_v8 }
  0x1f   : > { %2537 = vmatprep.mubr.msk.f32.mxu0 %vm265_vm1, %v233_v9 }
  0x22   : > { %2538 = vmatmul.mubr.msk.f32.gmra.mrb[8].mxu0 %vm265_vm1, %v234_v10 }
  0x23   : > { %2540 = vmatprep.mubr.msk.f32.mxu0 %vm265_vm1, %v235_v11 }
  0x26   : > { %2541 = vmatmul.mubr.msk.f32.gmra.mrb[10].mxu0 %vm265_vm1, %v236_v12 }
  0x27   : > { %2543 = vmatprep.mubr.msk.f32.mxu0 %vm265_vm1, %v237_v13 }
  0x2a   : > { %2544 = vmatmul.mubr.msk.f32.gmra.mrb[12].mxu0 %vm265_vm1, %v238_v14 }
  0x2b   : > { %2546 = vmatprep.mubr.msk.f32.mxu0 %vm265_vm1, %v239_v15 }
  0x2e   : > { %2547 = vmatmul.mubr.msk.f32.gmra.mrb[14].mxu0 %vm265_vm1, %v240_v16 }
  0x2f   : > { %2549 = vmatprep.mubr.msk.f32.mxu0 %vm265_vm1, %v241_v17 }
  0x32   : > { %2550 = vmatmul.mubr.msk.f32.gmra.mrb[16].mxu0 %vm265_vm1, %v242_v18 }
  0x33   : > { %2552 = vmatprep.mubr.msk.f32.mxu0 %vm265_vm1, %v243_v19 }
  0x36   : > { %2553 = vmatmul.mubr.msk.f32.gmra.mrb[18].mxu0 %vm265_vm1, %v244_v20 }
  0x37   : > { %2555 = vmatprep.mubr.msk.f32.mxu0 %vm265_vm1, %v245_v21 }
  0x3a   : > { %2556 = vmatmul.mubr.msk.f32.gmra.mrb[20].mxu0 %vm265_vm1, %v246_v22 }
  0x3b   : > { %2558 = vmatprep.mubr.msk.f32.mxu0 %vm265_vm1, %v247_v23 }
  0x3e   : > { %2559 = vmatmul.mubr.msk.f32.gmra.mrb[22].mxu0 %vm265_vm1, %v248_v24 }
  0x3f   : > { %2561 = vmatprep.mubr.msk.f32.mxu0 %vm265_vm1, %v249_v25 }
  0x42   : > { %2562 = vmatmul.mubr.msk.f32.gmra.mrb[24].mxu0 %vm265_vm1, %v250_v26 }
  0x43   : > { %2564 = vmatprep.mubr.msk.f32.mxu0 %vm265_vm1, %v251_v27 }
  0x46   : > { %2565 = vmatmul.mubr.msk.f32.gmra.mrb[26].mxu0 %vm265_vm1, %v252_v28 }
  0x47   : > { %2567 = vmatprep.mubr.msk.f32.mxu0 %vm265_vm1, %v253_v29 }
  0x4a   : > { %2568 = vmatmul.mubr.msk.f32.gmra.mrb[28].mxu0 %vm265_vm1, %v254_v30 }
  0x4b   : > { %2570 = vmatprep.mubr.msk.f32.mxu0 %vm265_vm1, %v255_v31 }
  0x4e   : > { %2571 = vmatmul.mubr.msk.f32.gmra.mrb[30].mxu0 %vm265_vm1, %v256_v32 }
  0xe5   : > { %v2527_v35 = vpop.f32.mrb[0].mxu0 }
  0xe6   : > { %v438_v36 = vadd.f32 %v2527_v35, %v2962_v34  ;;  %v432_v37 = vpop.f32.mrb[1].mxu0 }
  0xe7   : > { %v433_v39 = vadd.f32 %v2962_v34, %v432_v37 }
  0xe8   : > { %v592_v40 = vmax.f32 %v438_v36, 0.0 }
  0xe9   : > { %v591_v41 = vmax.f32 %v433_v39, 0.0  ;;  %v2530_v42 = vpop.f32.mrb[2].mxu0 }
  0xea   : > { %v657_v44 = vrot.slane %v592_v40, 7  ;;  %v448_v45 = vadd.f32 %v2530_v42, %v2962_v34  ;;  %v442_v46 = vpop.f32.mrb[3].mxu0 }
  0xeb   : > { %v656_v47 = vrot.slane %v591_v41, 7  ;;  %v443_v48 = vadd.f32 %v2962_v34, %v442_v46 }
  0xec   : > { %v594_v49 = vmax.f32 %v448_v45, 0.0  ;;  %v768_v50 = vsel %vm655_vm3, %v657_v44, 0.0 }
  0xed   : > { %v2979_v51 = vsel %vm655_vm3, %v656_v47, %v657_v44  ;;  %v2982_v52 = vsel %vm655_vm3, 0.0, %v656_v47  ;;  %v2533_v53 = vpop.f32.mrb[4].mxu0  ;;  %v593_v55 = vmax.f32 %v443_v48, 0.0  ;;  %v997_v63 = vrot.slane %v768_v50, 2 }
  0xee   : > { %v660_v54 = vrot.slane %v594_v49, 7  ;;  %v994_v56 = vrot.slane %v2982_v52, 2  ;;  %v995_v57 = vrot.slane %v2979_v51, 2  ;;  %v452_v58 = vpop.f32.mrb[5].mxu0  ;;  %v817_v59 = vrot.slane %v2982_v52, 1 }
  0xef   : > { %v818_v60 = vrot.slane %v2979_v51, 1  ;;  %v458_v61 = vadd.f32 %v2533_v53, %v2962_v34  ;;  %v453_v62 = vadd.f32 %v2962_v34, %v452_v58  ;;  %v659_v1 = vrot.slane %v593_v55, 7 }
  0xf0   : > { %v769_v0 = vsel %vm655_vm3, %v660_v54, 0.0  ;;  %v996_v2 = vsel %vm993_vm2, %v994_v56, %v995_v57  ;;  %v820_v3 = vrot.slane %v768_v50, 1  ;;  %v998_v16 = vsel %vm993_vm2, %v995_v57, %v997_v63 }
  0xf1   : > { %1074 = vrot.lane.b32.xlu1 %v996_v2, %s2839_s7  ;;  %v819_v4 = vsel %vm816_vm4, %v817_v59, %v818_v60  ;;  %v596_v5 = vmax.f32 %v458_v61, 0.0  ;;  %v2536_v6 = vpop.f32.mrb[6].mxu0  ;;  %v825_v7 = vrot.slane %v769_v0, 1  ;;  %v2995_v8 = vsel %vm655_vm3, %v659_v1, %v660_v54 }
  0xf2   : > { %v2998_v9 = vsel %vm655_vm3, 0.0, %v659_v1  ;;  %897 = vrot.lane.b32.xlu0 %v819_v4, %s2840_s8  ;;  %v595_v10 = vmax.f32 %v453_v62, 0.0  ;;  %v462_v11 = vpop.f32.mrb[7].mxu0  ;;  %v823_v14 = vrot.slane %v2995_v8, 1  ;;  %v468_v17 = vadd.f32 %v2536_v6, %v2962_v34 }
  0xf3   : > { %v822_v12 = vrot.slane %v2998_v9, 1  ;;  %v663_v13 = vrot.slane %v596_v5, 7  ;;  %v463_v18 = vadd.f32 %v2962_v34, %v462_v11  ;;  %v821_v19 = vsel %vm816_vm4, %v818_v60, %v820_v3 }
  0xf4   : > { %v662_v15 = vrot.slane %v595_v10, 7  ;;  %v826_v22 = vsel %vm816_vm4, %v823_v14, %v825_v7  ;;  %v598_v26 = vmax.f32 %v468_v17, 0.0  ;;  %v1002_v28 = vrot.slane %v769_v0, 2 }
  0xf5   : > { %1076 = vrot.lane.b32.xlu1 %v998_v16, %s2839_s7  ;;  %v2539_v20 = vpop.f32.mrb[8].mxu0  ;;  %v770_v24 = vsel %vm655_vm3, %v663_v13, 0.0  ;;  %v824_v25 = vsel %vm816_vm4, %v822_v12, %v823_v14  ;;  %v597_v27 = vmax.f32 %v463_v18, 0.0  ;;  %v1000_v30 = vrot.slane %v2995_v8, 2 }
  0xf6   : > { %v3009_v21 = vsel %vm655_vm3, %v662_v15, %v663_v13  ;;  %899 = vrot.lane.b32.xlu0 %v821_v19, %s2840_s8  ;;  %v472_v23 = vpop.f32.mrb[9].mxu0  ;;  %v3016_v29 = vsel %vm655_vm3, 0.0, %v662_v15  ;;  %v478_v31 = vadd.f32 %v2539_v20, %v2962_v34  ;;  %v999_v32 = vrot.slane %v2998_v9, 2 }
  0xf7   : > { %v666_v33 = vrot.slane %v598_v26, 7  ;;  %v665_v35 = vrot.slane %v597_v27, 7  ;;  %v473_v36 = vadd.f32 %v2962_v34, %v472_v23  ;;  %v830_v39 = vrot.slane %v770_v24, 1 }
  0xf8   : > { %v828_v40 = vrot.slane %v3009_v21, 1  ;;  %v600_v41 = vmax.f32 %v478_v31, 0.0  ;;  %v827_v44 = vrot.slane %v3016_v29, 1  ;;  %v1003_v47 = vsel %vm993_vm2, %v1000_v30, %v1002_v28 }
  0xf9   : > { %903 = vrot.lane.b32.xlu1 %v826_v22, %s2840_s8  ;;  %v2542_v37 = vpop.f32.mrb[10].mxu0  ;;  %v3028_v45 = vsel %vm655_vm3, %v665_v35, %v666_v33  ;;  %v599_v46 = vmax.f32 %v473_v36, 0.0  ;;  %v1001_v48 = vsel %vm993_vm2, %v999_v32, %v1000_v30  ;;  %v771_v58 = vsel %vm655_vm3, %v666_v33, 0.0 }
  0xfa   : > { %901 = vrot.lane.b32.xlu0 %v824_v25, %s2840_s8  ;;  %v488_v42 = vadd.f32 %v2542_v37, %v2962_v34  ;;  %v482_v43 = vpop.f32.mrb[11].mxu0  ;;  %v669_v49 = vrot.slane %v600_v41, 7  ;;  %v831_v54 = vsel %vm816_vm4, %v828_v40, %v830_v39  ;;  %v829_v59 = vsel %vm816_vm4, %v827_v44, %v828_v40 }
  0xfb   : > { %v668_v50 = vrot.slane %v599_v46, 7  ;;  %v483_v56 = vadd.f32 %v2962_v34, %v482_v43  ;;  %v1007_v62 = vrot.slane %v770_v24, 2  ;;  %v3043_v63 = vsel %vm655_vm3, 0.0, %v665_v35 }
  0xfc   : > { %v602_v55 = vmax.f32 %v488_v42, 0.0  ;;  %v1005_v0 = vrot.slane %v3009_v21, 2  ;;  %v1004_v1 = vrot.slane %v3016_v29, 2  ;;  %v835_v5 = vrot.slane %v771_v58, 1 }
  0xfd   : > { %1080 = vrot.lane.b32.xlu1 %v1003_v47, %s2839_s7  ;;  %v2545_v53 = vpop.f32.mrb[12].mxu0  ;;  %v3039_v60 = vsel %vm655_vm3, %v668_v50, %v669_v49  ;;  %v601_v3 = vmax.f32 %v483_v56, 0.0  ;;  %v833_v6 = vrot.slane %v3028_v45, 1  ;;  %v832_v11 = vrot.slane %v3043_v63, 1 }
  0xfe   : > { %1078 = vrot.lane.b32.xlu0 %v1001_v48, %s2839_s7  ;;  %v492_v57 = vpop.f32.mrb[13].mxu0  ;;  %v498_v61 = vadd.f32 %v2545_v53, %v2962_v34  ;;  %v672_v2 = vrot.slane %v602_v55, 7  ;;  %v1008_v14 = vsel %vm993_vm2, %v1005_v0, %v1007_v62  ;;  %v1006_v15 = vsel %vm993_vm2, %v1004_v1, %v1005_v0 }
  0xff   : > { %v671_v12 = vrot.slane %v601_v3, 7  ;;  %v493_v13 = vadd.f32 %v2962_v34, %v492_v57  ;;  %v836_v20 = vsel %vm816_vm4, %v833_v6, %v835_v5  ;;  %v772_v23 = vsel %vm655_vm3, %v669_v49, 0.0 }
 0x100   : > { %v604_v7 = vmax.f32 %v498_v61, 0.0  ;;  %v834_v24 = vsel %vm816_vm4, %v832_v11, %v833_v6  ;;  %v1012_v27 = vrot.slane %v771_v58, 2  ;;  %v3068_v28 = vsel %vm655_vm3, 0.0, %v668_v50 }
 0x101   : > { %907 = vrot.lane.b32.xlu1 %v831_v54, %s2840_s8  ;;  %v2548_v4 = vpop.f32.mrb[14].mxu0  ;;  %v3056_v16 = vsel %vm655_vm3, %v671_v12, %v672_v2  ;;  %v603_v18 = vmax.f32 %v493_v13, 0.0  ;;  %v1010_v30 = vrot.slane %v3028_v45, 2  ;;  %v1009_v32 = vrot.slane %v3043_v63, 2 }
 0x102   : > { %905 = vrot.lane.b32.xlu0 %v829_v59, %s2840_s8  ;;  %v502_v10 = vpop.f32.mrb[15].mxu0  ;;  %v3058_v17 = vrot.slane %v604_v7, 7  ;;  %v508_v26 = vadd.f32 %v2548_v4, %v2962_v34  ;;  %v840_v36 = vrot.slane %v772_v23, 1  ;;  %v838_v37 = vrot.slane %v3039_v60, 1 }
 0x103   : > { %v3064_v25 = vrot.slane %v603_v18, 7  ;;  %v503_v31 = vadd.f32 %v2962_v34, %v502_v10  ;;  %v837_v42 = vrot.slane %v3068_v28, 1  ;;  %v1013_v44 = vsel %vm993_vm2, %v1010_v30, %v1012_v27 }
 0x104   : > { %v606_v39 = vmax.f32 %v508_v26, 0.0  ;;  %v1011_v49 = vsel %vm993_vm2, %v1009_v32, %v1010_v30  ;;  %v841_v55 = vsel %vm816_vm4, %v838_v37, %v840_v36  ;;  %v1017_v59 = vrot.slane %v772_v23, 2 }
 0x105   : > { %1084 = vrot.lane.b32.xlu1 %v1008_v14, %s2839_s7  ;;  %v2551_v19 = vpop.f32.mrb[16].mxu0  ;;  %v3077_v33 = vsel %vm655_vm3, %v3064_v25, %v3058_v17  ;;  %v605_v40 = vmax.f32 %v503_v31, 0.0  ;;  %v773_v61 = vsel %vm655_vm3, %v672_v2, 0.0  ;;  %v839_v62 = vsel %vm816_vm4, %v837_v42, %v838_v37 }
 0x106   : > { %1082 = vrot.lane.b32.xlu0 %v1006_v15, %s2839_s7  ;;  %v512_v22 = vpop.f32.mrb[17].mxu0  ;;  %v518_v43 = vadd.f32 %v2551_v19, %v2962_v34  ;;  %v3084_v46 = vrot.slane %v606_v39, 7  ;;  %v3102_v0 = vsel %vm655_vm3, 0.0, %v671_v12  ;;  %v1015_v1 = vrot.slane %v3039_v60, 2 }
 0x107   : > { %v3086_v47 = vrot.slane %v605_v40, 7  ;;  %v513_v48 = vadd.f32 %v2962_v34, %v512_v22  ;;  %v1014_v5 = vrot.slane %v3068_v28, 2  ;;  %v845_v2 = vrot.slane %v773_v61, 1 }
 0x108   : > { %v608_v50 = vmax.f32 %v518_v43, 0.0  ;;  %v843_v11 = vrot.slane %v3056_v16, 1  ;;  %v842_v15 = vrot.slane %v3102_v0, 1  ;;  %v1018_v18 = vsel %vm993_vm2, %v1015_v1, %v1017_v59 }
 0x109   : > { %911 = vrot.lane.b32.xlu1 %v836_v20, %s2840_s8  ;;  %v2554_v35 = vpop.f32.mrb[18].mxu0  ;;  %v3097_v56 = vsel %vm655_vm3, %v3086_v47, %v3084_v46  ;;  %v607_v57 = vmax.f32 %v513_v48, 0.0  ;;  %v1016_v22 = vsel %vm993_vm2, %v1014_v5, %v1015_v1  ;;  %v774_v26 = vsel %vm655_vm3, %v3058_v17, 0.0 }
 0x10a   : > { %909 = vrot.lane.b32.xlu0 %v834_v24, %s2840_s8  ;;  %v522_v41 = vpop.f32.mrb[19].mxu0  ;;  %v528_v53 = vadd.f32 %v2554_v35, %v2962_v34  ;;  %v3105_v3 = vrot.slane %v608_v50, 7  ;;  %v846_v27 = vsel %vm816_vm4, %v843_v11, %v845_v2  ;;  %v1022_v35 = vrot.slane %v773_v61, 2  ;;  %v2354_v2 = vld [vmem:[%s3923_s3 + $0x10] sm:$0x3f] }
 0x10b   : > { %v3107_v4 = vrot.slane %v607_v57, 7  ;;  %v523_v7 = vadd.f32 %v2962_v34, %v522_v41  ;;  %v3135_v36 = vsel %vm655_vm3, 0.0, %v3064_v25  ;;  %v844_v37 = vsel %vm816_vm4, %v842_v15, %v843_v11  ;;  %2673 = vmatprep.subr.msk.mxu1 %vm993_vm2, %v2354_v2 }
 0x10c   : > { %v610_v6 = vmax.f32 %v528_v53, 0.0  ;;  %v1020_v39 = vrot.slane %v3056_v16, 2  ;;  %v1019_v42 = vrot.slane %v3102_v0, 2  ;;  %v850_v43 = vrot.slane %v774_v26, 1  ;;  %2674 = vmatpush3.msk.msra.mxu1 %vm993_vm2, %v2354_v2 }
 0x10d   : > { %1088 = vrot.lane.b32.xlu1 %v1013_v44, %s2839_s7  ;;  %v2557_v54 = vpop.f32.mrb[20].mxu0  ;;  %v3117_v12 = vsel %vm655_vm3, %v3107_v4, %v3105_v3  ;;  %v609_v20 = vmax.f32 %v523_v7, 0.0  ;;  %v847_v25 = vrot.slane %v3135_v36, 1  ;;  %v848_v48 = vrot.slane %v3077_v33, 1 }
 0x10e   : > { %1086 = vrot.lane.b32.xlu0 %v1011_v49, %s2839_s7  ;;  %v532_v58 = vpop.f32.mrb[21].mxu0  ;;  %v538_v13 = vadd.f32 %v2557_v54, %v2962_v34  ;;  %v3122_v19 = vrot.slane %v610_v6, 7  ;;  %v1027_v1 = vrot.slane %v774_v26, 2  ;;  %v775_v11 = vsel %vm655_vm3, %v3084_v46, 0.0 }
 0x10f   : > { %v3130_v30 = vrot.slane %v609_v20, 7  ;;  %v533_v31 = vadd.f32 %v2962_v34, %v532_v58  ;;  %v1021_v58 = vsel %vm993_vm2, %v1019_v42, %v1020_v39  ;;  %v851_v5 = vsel %vm816_vm4, %v848_v48, %v850_v43 }
 0x110   : > { %v612_v23 = vmax.f32 %v538_v13, 0.0  ;;  %v849_v6 = vsel %vm816_vm4, %v847_v25, %v848_v48  ;;  %v1025_v20 = vrot.slane %v3077_v33, 2  ;;  %v1024_v46 = vrot.slane %v3135_v36, 2 }
 0x111   : > { %915 = vrot.lane.b32.xlu1 %v841_v55, %s2840_s8  ;;  %v2560_v10 = vpop.f32.mrb[22].mxu0  ;;  %v3142_v17 = vsel %vm655_vm3, %v3130_v30, %v3122_v19  ;;  %v611_v41 = vmax.f32 %v533_v31, 0.0  ;;  %v1023_v55 = vsel %vm993_vm2, %v1020_v39, %v1022_v35  ;;  %v853_v31 = vrot.slane %v3097_v56, 1 }
 0x112   : > { %913 = vrot.lane.b32.xlu0 %v839_v62, %s2840_s8  ;;  %v542_v14 = vpop.f32.mrb[23].mxu0  ;;  %v3144_v40 = vrot.slane %v612_v23, 7  ;;  %v548_v50 = vadd.f32 %v2560_v10, %v2962_v34  ;;  %v858_v2 = vrot.slane %v3117_v12, 1 }
 0x113   : > { %v3151_v49 = vrot.slane %v611_v41, 7  ;;  %v543_v54 = vadd.f32 %v2962_v34, %v542_v14  ;;  %v1028_v41 = vsel %vm993_vm2, %v1025_v20, %v1027_v1  ;;  %v1030_v1 = vrot.slane %v3097_v56, 2 }
 0x114   : > { %v614_v59 = vmax.f32 %v548_v50, 0.0 }
 0x115   : > { %1092 = vrot.lane.b32.xlu1 %v1018_v18, %s2839_s7  ;;  %v2563_v24 = vpop.f32.mrb[24].mxu0  ;;  %v3159_v57 = vsel %vm655_vm3, %v3151_v49, %v3144_v40  ;;  %v613_v61 = vmax.f32 %v543_v54, 0.0  ;;  %v3180_v18 = vsel %vm655_vm3, 0.0, %v3086_v47  ;;  %v855_v47 = vrot.slane %v775_v11, 1 }
 0x116   : > { %1090 = vrot.lane.b32.xlu0 %v1016_v22, %s2839_s7  ;;  %v552_v32 = vpop.f32.mrb[25].mxu0  ;;  %v558_v7 = vadd.f32 %v2563_v24, %v2962_v34  ;;  %v3172_v13 = vrot.slane %v614_v59, 7  ;;  %v852_v35 = vrot.slane %v3180_v18, 1  ;;  %v776_v54 = vsel %vm655_vm3, %v3105_v3, 0.0 }
 0x117   : > { %v3174_v14 = vrot.slane %v613_v61, 7  ;;  %v553_v15 = vadd.f32 %v2962_v34, %v552_v32  ;;  %v856_v50 = vsel %vm816_vm4, %v853_v31, %v855_v47  ;;  %v1032_v59 = vrot.slane %v775_v11, 2 }
 0x118   : > { %v616_v22 = vmax.f32 %v558_v7, 0.0  ;;  %v3218_v61 = vsel %vm655_vm3, 0.0, %v3107_v4  ;;  %v860_v7 = vrot.slane %v776_v54, 1 }
 0x119   : > { %919 = vrot.lane.b32.xlu1 %v846_v27, %s2840_s8  ;;  %v2566_v44 = vpop.f32.mrb[26].mxu0  ;;  %v3190_v24 = vsel %vm655_vm3, %v3174_v14, %v3172_v13  ;;  %v615_v26 = vmax.f32 %v553_v15, 0.0  ;;  %v857_v11 = vrot.slane %v3218_v61, 1 }
 0x11a   : > { %917 = vrot.lane.b32.xlu0 %v844_v37, %s2840_s8  ;;  %v562_v53 = vpop.f32.mrb[27].mxu0  ;;  %v568_v23 = vadd.f32 %v2566_v44, %v2962_v34  ;;  %v3195_v37 = vrot.slane %v616_v22, 7  ;;  %v1026_v44 = vsel %vm993_vm2, %v1024_v46, %v1025_v20  ;;  %v1033_v22 = vsel %vm993_vm2, %v1030_v1, %v1032_v59 }
 0x11b   : > { %v3197_v39 = vrot.slane %v615_v26, 7  ;;  %v563_v43 = vadd.f32 %v2962_v34, %v562_v53  ;;  %v854_v53 = vsel %vm816_vm4, %v852_v35, %v853_v31  ;;  %v861_v26 = vsel %vm816_vm4, %v858_v2, %v860_v7 }
 0x11c   : > { %v618_v42 = vmax.f32 %v568_v23, 0.0  ;;  %v777_v31 = vsel %vm655_vm3, %v3122_v19, 0.0  ;;  %v859_v35 = vsel %vm816_vm4, %v857_v11, %v858_v2  ;;  %v3282_v7 = vsel %vm655_vm3, 0.0, %v3151_v49 }
 0x11d   : > { %1096 = vrot.lane.b32.xlu1 %v1023_v55, %s2839_s7  ;;  %v2569_v62 = vpop.f32.mrb[28].mxu0  ;;  %v3206_v25 = vsel %vm655_vm3, %v3197_v39, %v3195_v37  ;;  %v1040_v2 = vrot.slane %v3142_v17, 2 }
 0x11e   : > { %1094 = vrot.lane.b32.xlu0 %v1021_v58, %s2839_s7  ;;  %v572_v10 = vpop.f32.mrb[29].mxu0  ;;  %v578_v48 = vadd.f32 %v2569_v62, %v2962_v34  ;;  %v3214_v55 = vrot.slane %v618_v42, 7  ;;  %v617_v58 = vmax.f32 %v563_v43, 0.0  ;;  %v1037_v42 = vrot.slane %v776_v54, 2 }
 0x11f   : > { %v573_v3 = vadd.f32 %v2962_v34, %v572_v10  ;;  %v1035_v43 = vrot.slane %v3117_v12, 2 }
 0x120   : > { %v620_v62 = vmax.f32 %v578_v48, 0.0  ;;  %v863_v48 = vrot.slane %v3142_v17, 1 }
 0x121   : > { %923 = vrot.lane.b32.xlu1 %v851_v5, %s2840_s8  ;;  %v2572_v27 = vpop.f32.mrb[30].mxu0  ;;  %v1029_v5 = vrot.slane %v3180_v18, 2  ;;  %v619_v20 = vmax.f32 %v573_v3, 0.0  ;;  %v1042_v3 = vrot.slane %v777_v31, 2 }
 0x122   : > { %921 = vrot.lane.b32.xlu0 %v849_v6, %s2840_s8  ;;  %v582_v32 = vpop.f32.mrb[31].mxu0  ;;  %v3223_v6 = vrot.slane %v617_v58, 7  ;;  %v3234_v15 = vrot.slane %v620_v62, 7  ;;  %v588_v46 = vadd.f32 %v2572_v27, %v2962_v34  ;;  %v3255_v27 = vsel %vm655_vm3, 0.0, %v3130_v30 }
 0x123   : > { %v1031_v10 = vsel %vm993_vm2, %v1029_v5, %v1030_v1  ;;  %v3239_v23 = vrot.slane %v619_v20, 7  ;;  %v583_v47 = vadd.f32 %v2962_v34, %v582_v32  ;;  %v1034_v34 = vrot.slane %v3218_v61, 2 }
 0x124   : > { %v3232_v4 = vsel %vm655_vm3, %v3223_v6, %v3214_v55  ;;  %v865_v32 = vrot.slane %v777_v31, 1  ;;  %v862_v54 = vrot.slane %v3255_v27, 1  ;;  %v1038_v30 = vsel %vm993_vm2, %v1035_v43, %v1037_v42 }
 0x125   : > { %1100 = vrot.lane.b32.xlu1 %v1028_v41, %s2839_s7  ;;  %v3251_v41 = vsel %vm655_vm3, %v3239_v23, %v3234_v15  ;;  %v621_v19 = vmax.f32 %v583_v47, 0.0  ;;  %v1036_v58 = vsel %vm993_vm2, %v1034_v34, %v1035_v43  ;;  %v778_v62 = vsel %vm655_vm3, %v3144_v40, 0.0 }
 0x126   : > { %1098 = vrot.lane.b32.xlu0 %v1026_v44, %s2839_s7  ;;  %v622_v44 = vmax.f32 %v588_v46, 0.0  ;;  %v866_v1 = vsel %vm816_vm4, %v863_v48, %v865_v32  ;;  %v864_v5 = vsel %vm816_vm4, %v862_v54, %v863_v48  ;;  %v1039_v11 = vrot.slane %v3255_v27, 2 }
 0x127   : > { %v870_v20 = vrot.slane %v778_v62, 1  ;;  %v867_v40 = vrot.slane %v3282_v7, 1  ;;  %v1047_v31 = vrot.slane %v778_v62, 2  ;;  %v1045_v42 = vrot.slane %v3159_v57, 2 }
 0x128   : > { %v1041_v49 = vsel %vm993_vm2, %v1039_v11, %v1040_v2  ;;  %v1044_v43 = vrot.slane %v3282_v7, 2  ;;  %v873_v34 = vrot.slane %v3190_v24, 1  ;;  %v780_v48 = vsel %vm655_vm3, %v3195_v37, 0.0 }
 0x129   : > { %927 = vrot.lane.b32.xlu1 %v856_v50, %s2840_s8  ;;  %v3262_v50 = vrot.slane %v622_v44, 7 }
 0x12a   : > { %925 = vrot.lane.b32.xlu0 %v854_v53, %s2840_s8  ;;  %v3265_v53 = vrot.slane %v621_v19, 7  ;;  %v1048_v19 = vsel %vm993_vm2, %v1045_v42, %v1047_v31 }
 0x12c   : > { %v3273_v59 = vsel %vm655_vm3, %v3265_v53, %v3262_v50 }
 0x12d   : > { %1104 = vrot.lane.b32.xlu1 %v1033_v22, %s2839_s7  ;;  %v868_v22 = vrot.slane %v3159_v57, 1 }
 0x12e   : > { %1102 = vrot.lane.b32.xlu0 %v1031_v10, %s2839_s7  ;;  %v1043_v10 = vsel %vm993_vm2, %v1040_v2, %v1042_v3  ;;  %v878_v3 = vrot.slane %v3206_v25, 1 }
 0x12f   : > { %v871_v46 = vsel %vm816_vm4, %v868_v22, %v870_v20  ;;  %v869_v47 = vsel %vm816_vm4, %v867_v40, %v868_v22  ;;  %v781_v20 = vsel %vm655_vm3, %v3214_v55, 0.0  ;;  %v1057_v40 = vrot.slane %v780_v48, 2 }
 0x131   : > { %931 = vrot.lane.b32.xlu1 %v861_v26, %s2840_s8  ;;  %v779_v26 = vsel %vm655_vm3, %v3172_v13, 0.0 }
 0x132   : > { %929 = vrot.lane.b32.xlu0 %v859_v35, %s2840_s8  ;;  %v3300_v35 = vsel %vm655_vm3, 0.0, %v3174_v14  ;;  %v875_v44 = vrot.slane %v779_v26, 1  ;;  %v1046_v14 = vsel %vm993_vm2, %v1044_v43, %v1045_v42  ;;  %v782_v43 = vsel %vm655_vm3, %v3234_v15, 0.0 }
 0x133   : > { %v872_v13 = vrot.slane %v3300_v35, 1  ;;  %v1049_v62 = vrot.slane %v3300_v35, 2 }
 0x134   : > { %v876_v32 = vsel %vm816_vm4, %v873_v34, %v875_v44 }
 0x135   : > { %1108 = vrot.lane.b32.xlu1 %v1038_v30, %s2839_s7  ;;  %v874_v54 = vsel %vm816_vm4, %v872_v13, %v873_v34  ;;  %v1052_v30 = vrot.slane %v779_v26, 2  ;;  %v885_v26 = vrot.slane %v781_v20, 1  ;;  %v1062_v34 = vrot.slane %v781_v20, 2 }
 0x136   : > { %1106 = vrot.lane.b32.xlu0 %v1036_v58, %s2839_s7  ;;  %v3318_v58 = vsel %vm655_vm3, 0.0, %v3197_v39  ;;  %v3354_v13 = vsel %vm655_vm3, 0.0, %v3239_v23 }
 0x137   : > { %v877_v37 = vrot.slane %v3318_v58, 1  ;;  %v887_v15 = vrot.slane %v3354_v13, 1 }
 0x139   : > { %935 = vrot.lane.b32.xlu1 %v866_v1, %s2840_s8  ;;  %v1050_v1 = vrot.slane %v3190_v24, 2  ;;  %v879_v22 = vsel %vm816_vm4, %v877_v37, %v878_v3  ;;  %v1065_v37 = vrot.slane %v3251_v41, 2 }
 0x13a   : > { %933 = vrot.lane.b32.xlu0 %v864_v5, %s2840_s8  ;;  %v880_v5 = vrot.slane %v780_v48, 1  ;;  %v888_v48 = vrot.slane %v3251_v41, 1 }
 0x13b   : > { %v1053_v2 = vsel %vm993_vm2, %v1050_v1, %v1052_v30  ;;  %v1051_v39 = vsel %vm993_vm2, %v1049_v62, %v1050_v1  ;;  %v783_v1 = vsel %vm655_vm3, %v3262_v50, 0.0 }
 0x13c   : > { %v881_v11 = vsel %vm816_vm4, %v878_v3, %v880_v5  ;;  %v889_v62 = vsel %vm816_vm4, %v887_v15, %v888_v48  ;;  %v1067_v5 = vrot.slane %v782_v43, 2  ;;  %v3372_v3 = vsel %vm655_vm3, 0.0, %v3265_v53 }
 0x13d   : > { %1112 = vrot.lane.b32.xlu1 %v1043_v10, %s2839_s7  ;;  %v3336_v10 = vsel %vm655_vm3, 0.0, %v3223_v6  ;;  %v892_v50 = vrot.slane %v3372_v3, 1 }
 0x13e   : > { %1110 = vrot.lane.b32.xlu0 %v1041_v49, %s2839_s7  ;;  %v1055_v49 = vrot.slane %v3206_v25, 2  ;;  %v882_v55 = vrot.slane %v3336_v10, 1 }
 0x140   : > { %v1058_v31 = vsel %vm993_vm2, %v1055_v49, %v1057_v40  ;;  %v1068_v40 = vsel %vm993_vm2, %v1065_v37, %v1067_v5 }
 0x141   : > { %939 = vrot.lane.b32.xlu1 %v871_v46, %s2840_s8  ;;  %v1054_v46 = vrot.slane %v3318_v58, 2 }
 0x142   : > { %937 = vrot.lane.b32.xlu0 %v869_v47, %s2840_s8  ;;  %v883_v47 = vrot.slane %v3232_v4, 1 }
 0x143   : > { %v1056_v6 = vsel %vm993_vm2, %v1054_v46, %v1055_v49  ;;  %v1072_v46 = vrot.slane %v783_v1, 2 }
 0x144   : > { %v886_v42 = vsel %vm816_vm4, %v883_v47, %v885_v26  ;;  %v884_v44 = vsel %vm816_vm4, %v882_v55, %v883_v47  ;;  %v1070_v55 = vrot.slane %v3273_v59, 2 }
 0x145   : > { %1116 = vrot.lane.b32.xlu1 %v1048_v19, %s2839_s7  ;;  %v1060_v19 = vrot.slane %v3232_v4, 2 }
 0x146   : > { %1114 = vrot.lane.b32.xlu0 %v1046_v14, %s2839_s7  ;;  %v1059_v14 = vrot.slane %v3336_v10, 2 }
 0x148   : > { %v1061_v23 = vsel %vm993_vm2, %v1059_v14, %v1060_v19 }
 0x149   : > { %943 = vrot.lane.b32.xlu1 %v876_v32, %s2840_s8  ;;  %v890_v32 = vrot.slane %v782_v43, 1 }
 0x14a   : > { %941 = vrot.lane.b32.xlu0 %v874_v54, %s2840_s8  ;;  %v1063_v54 = vsel %vm993_vm2, %v1060_v19, %v1062_v34  ;;  %v1073_v34 = vsel %vm993_vm2, %v1070_v55, %v1072_v46 }
 0x14b   : > { %v891_v30 = vsel %vm816_vm4, %v888_v48, %v890_v32 }
 0x14d   : > { %1120 = vrot.lane.b32.xlu1 %v1053_v2, %s2839_s7  ;;  %v1064_v2 = vrot.slane %v3354_v13, 2 }
 0x14e   : > { %1118 = vrot.lane.b32.xlu0 %v1051_v39, %s2839_s7  ;;  %v895_v39 = vrot.slane %v783_v1, 1 }
 0x14f   : > { %v1066_v49 = vsel %vm993_vm2, %v1064_v2, %v1065_v37 }
 0x151   : > { %947 = vrot.lane.b32.xlu1 %v881_v11, %s2840_s8  ;;  %v893_v11 = vrot.slane %v3273_v59, 1 }
 0x152   : > { %945 = vrot.lane.b32.xlu0 %v879_v22, %s2840_s8 }
 0x153   : > { %v896_v47 = vsel %vm816_vm4, %v893_v11, %v895_v39 }
 0x155   : > { %1124 = vrot.lane.b32.xlu1 %v1058_v31, %s2839_s7  ;;  %v1069_v31 = vrot.slane %v3372_v3, 2 }
 0x156   : > { %1122 = vrot.lane.b32.xlu0 %v1056_v6, %s2839_s7  ;;  %v894_v6 = vsel %vm816_vm4, %v892_v50, %v893_v11 }
 0x157   : > { %v1071_v14 = vsel %vm993_vm2, %v1069_v31, %v1070_v55 }
 0x159   : > { %951 = vrot.lane.b32.xlu1 %v886_v42, %s2840_s8 }
 0x15a   : > { %949 = vrot.lane.b32.xlu0 %v884_v44, %s2840_s8 }
 0x15d   : > { %1128 = vrot.lane.b32.xlu1 %v1063_v54, %s2839_s7 }
 0x15e   : > { %1126 = vrot.lane.b32.xlu0 %v1061_v23, %s2839_s7 }
 0x161   : > { %955 = vrot.lane.b32.xlu1 %v891_v30, %s2840_s8 }
 0x162   : > { %953 = vrot.lane.b32.xlu0 %v889_v62, %s2840_s8 }
 0x163   : > { %v1075_v20 = vpop.permute.xlu1 %1074 }
 0x164   : > { %v898_v22 = vpop.permute.xlu0 %897 }
 0x165   : > { %v1171_v53 = vsel %vm1170_vm5, %v2982_v52, %v898_v22  ;;  %1132 = vrot.lane.b32.xlu1 %v1068_v40, %s2839_s7 }
 0x166   : > { %1130 = vrot.lane.b32.xlu0 %v1066_v49, %s2839_s7  ;;  %v1203_v26 = vsel %vm265_vm1, %v1171_v53, %v1075_v20 }
 0x167   : > { %2575 = vmatprep.mubr.msk.f32.mxu0 %vm1238_vm6, %v1203_v26  ;;  %2628 = vmatprep.mubr.msk.f32.mxu1 %vm1238_vm6, %v1203_v26  ;;  %v1077_v52 = vpop.permute.xlu1 %1076 }
 0x168   : > { %v900_v42 = vpop.permute.xlu0 %899 }
 0x169   : > { %v1172_v43 = vsel %vm1170_vm5, %v2979_v51, %v900_v42  ;;  %959 = vrot.lane.b32.xlu1 %v896_v47, %s2840_s8 }
 0x16a   : > { %v1204_v44 = vsel %vm265_vm1, %v1172_v43, %v1077_v52  ;;  %957 = vrot.lane.b32.xlu0 %v894_v6, %s2840_s8 }
 0x16b   : > { %2576 = vmatmul.mubr.msk.f32.vlgmr.msra.gmra.mrb[32].mxu0 %vm1238_vm6, %v1204_v44  ;;  %2629 = vmatmul.mubr.msk.f32.gmra.mrb[2].mxu1 %vm1238_vm6, %v1204_v44  ;;  %v904_v19 = vpop.permute.xlu1 %903 }
 0x16c   : > { %v902_v32 = vpop.permute.xlu0 %901  ;;  %v1174_v51 = vsel %vm1170_vm5, %v2995_v8, %v904_v19 }
 0x16d   : > { %1136 = vrot.lane.b32.xlu1 %v1073_v34, %s2839_s7  ;;  %v1173_v15 = vsel %vm1170_vm5, %v2998_v9, %v902_v32 }
 0x16e   : > { %1134 = vrot.lane.b32.xlu0 %v1071_v14, %s2839_s7 }
 0x16f   : > { %v1081_v48 = vpop.permute.xlu1 %1080 }
 0x170   : > { %v3409_v54 = vsel %vm265_vm1, %v1174_v51, %v1081_v48  ;;  %v1079_v23 = vpop.permute.xlu0 %1078 }
 0x171   : > { %v3412_v30 = vsel %vm265_vm1, %v1173_v15, %v1079_v23 }
 0x172   : > { %2578 = vmatprep.mubr.msk.f32.mxu0 %vm1238_vm6, %v3412_v30  ;;  %2631 = vmatprep.mubr.msk.f32.mxu1 %vm1238_vm6, %v3412_v30 }
 0x173   : > { %2579 = vmatmul.mubr.msk.f32.gmra.mrb[34].mxu0 %vm1238_vm6, %v3409_v54  ;;  %2632 = vmatmul.mubr.msk.f32.gmra.mrb[4].mxu1 %vm1238_vm6, %v3409_v54  ;;  %v908_v8 = vpop.permute.xlu1 %907 }
 0x174   : > { %v906_v9 = vpop.permute.xlu0 %905  ;;  %v1176_v1 = vsel %vm1170_vm5, %v3009_v21, %v908_v8 }
 0x175   : > { %v1175_v5 = vsel %vm1170_vm5, %v3016_v29, %v906_v9 }
 0x177   : > { %v1085_v62 = vpop.permute.xlu1 %1084 }
 0x178   : > { %v3427_v37 = vsel %vm265_vm1, %v1176_v1, %v1085_v62  ;;  %v1083_v2 = vpop.permute.xlu0 %1082 }
 0x179   : > { %v3430_v39 = vsel %vm265_vm1, %v1175_v5, %v1083_v2 }
 0x17a   : > { %2581 = vmatprep.mubr.msk.f32.mxu0 %vm1238_vm6, %v3430_v39  ;;  %2634 = vmatprep.mubr.msk.f32.mxu1 %vm1238_vm6, %v3430_v39 }
 0x17b   : > { %2582 = vmatmul.mubr.msk.f32.gmra.mrb[36].mxu0 %vm1238_vm6, %v3427_v37  ;;  %2635 = vmatmul.mubr.msk.f32.gmra.mrb[6].mxu1 %vm1238_vm6, %v3427_v37  ;;  %v912_v21 = vpop.permute.xlu1 %911 }
 0x17c   : > { %v910_v29 = vpop.permute.xlu0 %909  ;;  %v1178_v11 = vsel %vm1170_vm5, %v3028_v45, %v912_v21 }
 0x17d   : > { %v1177_v20 = vsel %vm1170_vm5, %v3043_v63, %v910_v29 }
 0x17f   : > { %v1089_v50 = vpop.permute.xlu1 %1088 }
 0x180   : > { %v3445_v22 = vsel %vm265_vm1, %v1178_v11, %v1089_v50  ;;  %v1087_v40 = vpop.permute.xlu0 %1086 }
 0x181   : > { %v3448_v53 = vsel %vm265_vm1, %v1177_v20, %v1087_v40 }
 0x182   : > { %2584 = vmatprep.mubr.msk.f32.mxu0 %vm1238_vm6, %v3448_v53  ;;  %2637 = vmatprep.mubr.msk.f32.mxu1 %vm1238_vm6, %v3448_v53 }
 0x183   : > { %2585 = vmatmul.mubr.msk.f32.gmra.mrb[38].mxu0 %vm1238_vm6, %v3445_v22  ;;  %2638 = vmatmul.mubr.msk.f32.gmra.mrb[8].mxu1 %vm1238_vm6, %v3445_v22  ;;  %v916_v45 = vpop.permute.xlu1 %915 }
 0x184   : > { %v914_v63 = vpop.permute.xlu0 %913  ;;  %v1180_v49 = vsel %vm1170_vm5, %v3039_v60, %v916_v45 }
 0x185   : > { %v1179_v26 = vsel %vm1170_vm5, %v3068_v28, %v914_v63 }
 0x187   : > { %v1093_v46 = vpop.permute.xlu1 %1092 }
 0x188   : > { %v3463_v47 = vsel %vm265_vm1, %v1180_v49, %v1093_v46  ;;  %v1091_v55 = vpop.permute.xlu0 %1090 }
 0x189   : > { %v3466_v31 = vsel %vm265_vm1, %v1179_v26, %v1091_v55 }
 0x18a   : > { %2587 = vmatprep.mubr.msk.f32.mxu0 %vm1238_vm6, %v3466_v31  ;;  %2640 = vmatprep.mubr.msk.f32.mxu1 %vm1238_vm6, %v3466_v31 }
 0x18b   : > { %2588 = vmatmul.mubr.msk.f32.gmra.mrb[40].mxu0 %vm1238_vm6, %v3463_v47  ;;  %2641 = vmatmul.mubr.msk.f32.gmra.mrb[10].mxu1 %vm1238_vm6, %v3463_v47  ;;  %v920_v60 = vpop.permute.xlu1 %919 }
 0x18c   : > { %v918_v28 = vpop.permute.xlu0 %917  ;;  %v1182_v52 = vsel %vm1170_vm5, %v3056_v16, %v920_v60 }
 0x18d   : > { %v1181_v42 = vsel %vm1170_vm5, %v3102_v0, %v918_v28 }
 0x18f   : > { %v1097_v6 = vpop.permute.xlu1 %1096 }
 0x190   : > { %v3481_v43 = vsel %vm265_vm1, %v1182_v52, %v1097_v6  ;;  %v1095_v44 = vpop.permute.xlu0 %1094 }
 0x191   : > { %v3484_v34 = vsel %vm265_vm1, %v1181_v42, %v1095_v44 }
 0x192   : > { %2590 = vmatprep.mubr.msk.f32.mxu0 %vm1238_vm6, %v3484_v34  ;;  %2643 = vmatprep.mubr.msk.f32.mxu1 %vm1238_vm6, %v3484_v34 }
 0x193   : > { %2591 = vmatmul.mubr.msk.f32.gmra.mrb[42].mxu0 %vm1238_vm6, %v3481_v43  ;;  %2644 = vmatmul.mubr.msk.f32.gmra.mrb[12].mxu1 %vm1238_vm6, %v3481_v43  ;;  %v924_v16 = vpop.permute.xlu1 %923 }
 0x194   : > { %v922_v0 = vpop.permute.xlu0 %921  ;;  %v1184_v19 = vsel %vm1170_vm5, %v3077_v33, %v924_v16 }
 0x195   : > { %v1183_v32 = vsel %vm1170_vm5, %v3135_v36, %v922_v0 }
 0x197   : > { %v1101_v14 = vpop.permute.xlu1 %1100 }
 0x198   : > { %v3499_v51 = vsel %vm265_vm1, %v1184_v19, %v1101_v14  ;;  %v1099_v48 = vpop.permute.xlu0 %1098 }
 0x199   : > { %v3502_v15 = vsel %vm265_vm1, %v1183_v32, %v1099_v48 }
 0x19a   : > { %2593 = vmatprep.mubr.msk.f32.mxu0 %vm1238_vm6, %v3502_v15  ;;  %2646 = vmatprep.mubr.msk.f32.mxu1 %vm1238_vm6, %v3502_v15 }
 0x19b   : > { %2594 = vmatmul.mubr.msk.f32.gmra.mrb[44].mxu0 %vm1238_vm6, %v3499_v51  ;;  %2647 = vmatmul.mubr.msk.f32.gmra.mrb[14].mxu1 %vm1238_vm6, %v3499_v51  ;;  %v928_v33 = vpop.permute.xlu1 %927 }
 0x19c   : > { %v926_v36 = vpop.permute.xlu0 %925  ;;  %v1186_v23 = vsel %vm1170_vm5, %v3097_v56, %v928_v33 }
 0x19d   : > { %v1185_v9 = vsel %vm1170_vm5, %v3180_v18, %v926_v36 }
 0x19f   : > { %v1105_v8 = vpop.permute.xlu1 %1104 }
 0x1a0   : > { %v3517_v1 = vsel %vm265_vm1, %v1186_v23, %v1105_v8  ;;  %v1103_v62 = vpop.permute.xlu0 %1102 }
 0x1a1   : > { %v3520_v5 = vsel %vm265_vm1, %v1185_v9, %v1103_v62 }
 0x1a2   : > { %2596 = vmatprep.mubr.msk.f32.mxu0 %vm1238_vm6, %v3520_v5  ;;  %2649 = vmatprep.mubr.msk.f32.mxu1 %vm1238_vm6, %v3520_v5 }
 0x1a3   : > { %2597 = vmatmul.mubr.msk.f32.gmra.mrb[46].mxu0 %vm1238_vm6, %v3517_v1  ;;  %2650 = vmatmul.mubr.msk.f32.gmra.mrb[16].mxu1 %vm1238_vm6, %v3517_v1  ;;  %v932_v56 = vpop.permute.xlu1 %931 }
 0x1a4   : > { %v930_v18 = vpop.permute.xlu0 %929  ;;  %v1188_v2 = vsel %vm1170_vm5, %v3117_v12, %v932_v56 }
 0x1a5   : > { %v1187_v29 = vsel %vm1170_vm5, %v3218_v61, %v930_v18 }
 0x1a7   : > { %v1109_v21 = vpop.permute.xlu1 %1108 }
 0x1a8   : > { %v3535_v11 = vsel %vm265_vm1, %v1188_v2, %v1109_v21  ;;  %v1107_v50 = vpop.permute.xlu0 %1106 }
 0x1a9   : > { %v3538_v20 = vsel %vm265_vm1, %v1187_v29, %v1107_v50 }
 0x1aa   : > { %2599 = vmatprep.mubr.msk.f32.mxu0 %vm1238_vm6, %v3538_v20  ;;  %2652 = vmatprep.mubr.msk.f32.mxu1 %vm1238_vm6, %v3538_v20 }
 0x1ab   : > { %2600 = vmatmul.mubr.msk.f32.gmra.mrb[48].mxu0 %vm1238_vm6, %v3535_v11  ;;  %2653 = vmatmul.mubr.msk.f32.gmra.mrb[18].mxu1 %vm1238_vm6, %v3535_v11  ;;  %v936_v12 = vpop.permute.xlu1 %935 }
 0x1ac   : > { %v934_v61 = vpop.permute.xlu0 %933  ;;  %v1190_v40 = vsel %vm1170_vm5, %v3142_v17, %v936_v12 }
 0x1ad   : > { %v1189_v63 = vsel %vm1170_vm5, %v3255_v27, %v934_v61 }
 0x1af   : > { %v1113_v45 = vpop.permute.xlu1 %1112 }
 0x1b0   : > { %v3553_v49 = vsel %vm265_vm1, %v1190_v40, %v1113_v45  ;;  %v1111_v46 = vpop.permute.xlu0 %1110 }
 0x1b1   : > { %v3556_v26 = vsel %vm265_vm1, %v1189_v63, %v1111_v46 }
 0x1b2   : > { %2602 = vmatprep.mubr.msk.f32.mxu0 %vm1238_vm6, %v3556_v26  ;;  %2655 = vmatprep.mubr.msk.f32.mxu1 %vm1238_vm6, %v3556_v26 }
 0x1b3   : > { %2603 = vmatmul.mubr.msk.f32.gmra.mrb[50].mxu0 %vm1238_vm6, %v3553_v49  ;;  %2656 = vmatmul.mubr.msk.f32.gmra.mrb[20].mxu1 %vm1238_vm6, %v3553_v49  ;;  %v940_v17 = vpop.permute.xlu1 %939 }
 0x1b4   : > { %v938_v27 = vpop.permute.xlu0 %937  ;;  %v1192_v55 = vsel %vm1170_vm5, %v3159_v57, %v940_v17 }
 0x1b5   : > { %v1191_v28 = vsel %vm1170_vm5, %v3282_v7, %v938_v27 }
 0x1b7   : > { %v1117_v60 = vpop.permute.xlu1 %1116 }
 0x1b8   : > { %v3571_v52 = vsel %vm265_vm1, %v1192_v55, %v1117_v60  ;;  %v1115_v6 = vpop.permute.xlu0 %1114 }
 0x1b9   : > { %v3574_v42 = vsel %vm265_vm1, %v1191_v28, %v1115_v6 }
 0x1ba   : > { %2605 = vmatprep.mubr.msk.f32.mxu0 %vm1238_vm6, %v3574_v42  ;;  %2658 = vmatprep.mubr.msk.f32.mxu1 %vm1238_vm6, %v3574_v42 }
 0x1bb   : > { %2606 = vmatmul.mubr.msk.f32.gmra.mrb[52].mxu0 %vm1238_vm6, %v3571_v52  ;;  %2659 = vmatmul.mubr.msk.f32.gmra.mrb[22].mxu1 %vm1238_vm6, %v3571_v52  ;;  %v944_v57 = vpop.permute.xlu1 %943 }
 0x1bc   : > { %v942_v7 = vpop.permute.xlu0 %941  ;;  %v1194_v44 = vsel %vm1170_vm5, %v3190_v24, %v944_v57 }
 0x1bd   : > { %v1193_v0 = vsel %vm1170_vm5, %v3300_v35, %v942_v7 }
 0x1bf   : > { %v1121_v16 = vpop.permute.xlu1 %1120 }
 0x1c0   : > { %v3589_v19 = vsel %vm265_vm1, %v1194_v44, %v1121_v16  ;;  %v1119_v14 = vpop.permute.xlu0 %1118 }
 0x1c1   : > { %v3592_v32 = vsel %vm265_vm1, %v1193_v0, %v1119_v14 }
 0x1c2   : > { %2608 = vmatprep.mubr.msk.f32.mxu0 %vm1238_vm6, %v3592_v32  ;;  %2661 = vmatprep.mubr.msk.f32.mxu1 %vm1238_vm6, %v3592_v32 }
 0x1c3   : > { %2609 = vmatmul.mubr.msk.f32.gmra.mrb[54].mxu0 %vm1238_vm6, %v3589_v19  ;;  %2662 = vmatmul.mubr.msk.f32.gmra.mrb[24].mxu1 %vm1238_vm6, %v3589_v19  ;;  %v948_v24 = vpop.permute.xlu1 %947 }
 0x1c4   : > { %v946_v35 = vpop.permute.xlu0 %945  ;;  %v1196_v48 = vsel %vm1170_vm5, %v3206_v25, %v948_v24 }
 0x1c5   : > { %v1195_v36 = vsel %vm1170_vm5, %v3318_v58, %v946_v35 }
 0x1c7   : > { %v1125_v33 = vpop.permute.xlu1 %1124 }
 0x1c8   : > { %v3607_v23 = vsel %vm265_vm1, %v1196_v48, %v1125_v33  ;;  %v1123_v8 = vpop.permute.xlu0 %1122 }
 0x1c9   : > { %v1227_v9 = vsel %vm265_vm1, %v1195_v36, %v1123_v8 }
 0x1ca   : > { %2611 = vmatprep.mubr.msk.f32.mxu0 %vm1238_vm6, %v1227_v9  ;;  %2664 = vmatprep.mubr.msk.f32.mxu1 %vm1238_vm6, %v1227_v9 }
 0x1cb   : > { %2612 = vmatmul.mubr.msk.f32.gmra.mrb[56].mxu0 %vm1238_vm6, %v3607_v23  ;;  %2665 = vmatmul.mubr.msk.f32.gmra.mrb[26].mxu1 %vm1238_vm6, %v3607_v23  ;;  %v952_v25 = vpop.permute.xlu1 %951 }
 0x1cc   : > { %v950_v62 = vpop.permute.xlu0 %949  ;;  %v1198_v58 = vsel %vm1170_vm5, %v3232_v4, %v952_v25 }
 0x1cd   : > { %v1197_v18 = vsel %vm1170_vm5, %v3336_v10, %v950_v62 }
 0x1cf   : > { %v1129_v56 = vpop.permute.xlu1 %1128 }
 0x1d0   : > { %v1230_v2 = vsel %vm265_vm1, %v1198_v58, %v1129_v56  ;;  %v1127_v21 = vpop.permute.xlu0 %1126 }
 0x1d1   : > { %v1229_v29 = vsel %vm265_vm1, %v1197_v18, %v1127_v21  ;;  %v2799_v18 = vld [vmem:[%s2890_s25] sm:$0xff] }
 0x1d2   : > { %2614 = vmatprep.mubr.msk.f32.mxu0 %vm1238_vm6, %v1229_v29  ;;  %2667 = vmatprep.mubr.msk.f32.mxu1 %vm1238_vm6, %v1229_v29 }
 0x1d3   : > { %2615 = vmatmul.mubr.msk.f32.gmra.mrb[58].mxu0 %vm1238_vm6, %v1230_v2  ;;  %2668 = vmatmul.mubr.msk.f32.gmra.mrb[28].mxu1 %vm1238_vm6, %v1230_v2  ;;  %v956_v50 = vpop.permute.xlu1 %955 }
 0x1d4   : > { %v954_v12 = vpop.permute.xlu0 %953  ;;  %v1200_v4 = vsel %vm1170_vm5, %v3251_v41, %v956_v50 }
 0x1d5   : > { %v1199_v10 = vsel %vm1170_vm5, %v3354_v13, %v954_v12 }
 0x1d7   : > { %v1133_v61 = vpop.permute.xlu1 %1132 }
 0x1d8   : > { %v1232_v40 = vsel %vm265_vm1, %v1200_v4, %v1133_v61  ;;  %v1131_v45 = vpop.permute.xlu0 %1130 }
 0x1d9   : > { %v1231_v63 = vsel %vm265_vm1, %v1199_v10, %v1131_v45  ;;  %v2800_v10 = vld [vmem:[%s2890_s25 + $0x18] sm:$0xff] }
 0x1da   : > { %2617 = vmatprep.mubr.msk.f32.mxu0 %vm1238_vm6, %v1231_v63  ;;  %2670 = vmatprep.mubr.msk.f32.mxu1 %vm1238_vm6, %v1231_v63 }
 0x1db   : > { %2618 = vmatmul.mubr.msk.f32.gmra.mrb[60].mxu0 %vm1238_vm6, %v1232_v40  ;;  %2671 = vmatmul.mubr.msk.f32.gmra.mrb[30].mxu1 %vm1238_vm6, %v1232_v40  ;;  %v960_v46 = vpop.permute.xlu1 %959 }
 0x1dc   : > { %2675 = vmatprep.mubr.msk.f32.mxu1 %vm1238_vm6, %v3412_v30  ;;  %v958_v41 = vpop.permute.xlu0 %957  ;;  %v1202_v13 = vsel %vm1170_vm5, %v3273_v59, %v960_v46  ;;  %v2801_v46 = vld [vmem:[%s2890_s25 + $0x10] sm:$0xff] }
 0x1dd   : > { %v1201_v27 = vsel %vm1170_vm5, %v3372_v3, %v958_v41 }
 0x1df   : > { %2676 = vmatmul.mubr.msk.f32.vlgmr.msra.gmra.mrb[0].mxu1 %vm1238_vm6, %v3409_v54  ;;  %v1137_v17 = vpop.permute.xlu1 %1136 }
 0x1e0   : > { %v1234_v55 = vsel %vm265_vm1, %v1202_v13, %v1137_v17  ;;  %2678 = vmatprep.mubr.msk.f32.mxu1 %vm1238_vm6, %v3430_v39  ;;  %v1135_v60 = vpop.permute.xlu0 %1134 }
 0x1e1   : > { %v1233_v28 = vsel %vm265_vm1, %v1201_v27, %v1135_v60 }
 0x1e2   : > { %2620 = vmatprep.mubr.msk.f32.mxu0 %vm1238_vm6, %v1233_v28 }
 0x1e3   : > { %2621 = vmatmul.mubr.msk.f32.gmra.mrb[62].mxu0 %vm1238_vm6, %v1234_v55  ;;  %2679 = vmatmul.mubr.msk.f32.gmra.mrb[2].mxu1 %vm1238_vm6, %v3427_v37 }
 0x1e4   : > { %2681 = vmatprep.mubr.msk.f32.mxu1 %vm1238_vm6, %v3448_v53 }
 0x1e7   : > { %2682 = vmatmul.mubr.msk.f32.gmra.mrb[4].mxu1 %vm1238_vm6, %v3445_v22 }
 0x1e8   : > { %2684 = vmatprep.mubr.msk.f32.mxu1 %vm1238_vm6, %v3466_v31 }
 0x1eb   : > { %2685 = vmatmul.mubr.msk.f32.gmra.mrb[6].mxu1 %vm1238_vm6, %v3463_v47 }
 0x1ec   : > { %2687 = vmatprep.mubr.msk.f32.mxu1 %vm1238_vm6, %v3484_v34 }
 0x1ef   : > { %2688 = vmatmul.mubr.msk.f32.gmra.mrb[8].mxu1 %vm1238_vm6, %v3481_v43 }
 0x1f0   : > { %2690 = vmatprep.mubr.msk.f32.mxu1 %vm1238_vm6, %v3502_v15 }
 0x1f3   : > { %2691 = vmatmul.mubr.msk.f32.gmra.mrb[10].mxu1 %vm1238_vm6, %v3499_v51 }
 0x1f4   : > { %2693 = vmatprep.mubr.msk.f32.mxu1 %vm1238_vm6, %v3520_v5 }
 0x1f7   : > { %2694 = vmatmul.mubr.msk.f32.gmra.mrb[12].mxu1 %vm1238_vm6, %v3517_v1 }
 0x1f8   : > { %2696 = vmatprep.mubr.msk.f32.mxu1 %vm1238_vm6, %v3538_v20 }
 0x1fb   : > { %2697 = vmatmul.mubr.msk.f32.gmra.mrb[14].mxu1 %vm1238_vm6, %v3535_v11 }
 0x1fc   : > { %2699 = vmatprep.mubr.msk.f32.mxu1 %vm1238_vm6, %v3556_v26 }
 0x1ff   : > { %2700 = vmatmul.mubr.msk.f32.gmra.mrb[16].mxu1 %vm1238_vm6, %v3553_v49 }
 0x200   : > { %2702 = vmatprep.mubr.msk.f32.mxu1 %vm1238_vm6, %v3574_v42 }
 0x203   : > { %2703 = vmatmul.mubr.msk.f32.gmra.mrb[18].mxu1 %vm1238_vm6, %v3571_v52 }
 0x204   : > { %2705 = vmatprep.mubr.msk.f32.mxu1 %vm1238_vm6, %v3592_v32  ;;  %v3750_v32 = vld [vmem:[%s3924_s4] ss:$0 sm:$0xff] }
 0x207   : > { %2706 = vmatmul.mubr.msk.f32.gmra.mrb[20].mxu1 %vm1238_vm6, %v3589_v19 }
 0x208   : > { %2708 = vmatprep.mubr.msk.f32.mxu1 %vm1238_vm6, %v1227_v9  ;;  %v2798_v9 = vld [vmem:[%s2890_s25 + $0x8] sm:$0xff] }
 0x20b   : > { %2709 = vmatmul.mubr.msk.f32.gmra.mrb[22].mxu1 %vm1238_vm6, %v3607_v23 }
 0x20c   : > { %2711 = vmatprep.mubr.msk.f32.mxu1 %vm1238_vm6, %v1229_v29 }
 0x20f   : > { %2712 = vmatmul.mubr.msk.f32.gmra.mrb[24].mxu1 %vm1238_vm6, %v1230_v2 }
 0x210   : > { %2714 = vmatprep.mubr.msk.f32.mxu1 %vm1238_vm6, %v1231_v63 }
 0x213   : > { %2715 = vmatmul.mubr.msk.f32.gmra.mrb[26].mxu1 %vm1238_vm6, %v1232_v40 }
 0x214   : > { %2717 = vmatprep.mubr.msk.f32.mxu1 %vm1238_vm6, %v1233_v28 }
 0x217   : > { %2718 = vmatmul.mubr.msk.f32.gmra.mrb[28].mxu1 %vm1238_vm6, %v1234_v55 }
 0x218   : > { %2720 = vmatprep.mubr.f32.mxu1 %v2838_v38 }
 0x21b   : > { %2721 = vmatmul.mubr.f32.gmra.mrb[30].mxu1 %v2838_v38 }
 0x23e   : > { %v2577_v59 = vpop.f32.mrb[32].mxu0 }
 0x23f   : > { %v1404_v3 = vpop.f32.mrb[33].mxu0 }
 0x246   : > { %v2580_v54 = vpop.f32.mrb[34].mxu0 }
 0x247   : > { %v1414_v30 = vpop.f32.mrb[35].mxu0 }
 0x24e   : > { %v2583_v37 = vpop.f32.mrb[36].mxu0 }
 0x24f   : > { %v1424_v39 = vpop.f32.mrb[37].mxu0 }
 0x256   : > { %v3699_v22 = vpop.f32.mrb[38].mxu0 }
 0x257   : > { %v3701_v53 = vpop.f32.mrb[39].mxu0 }
 0x25e   : > { %v3703_v47 = vpop.f32.mrb[40].mxu0 }
 0x25f   : > { %v3705_v31 = vpop.f32.mrb[41].mxu0 }
 0x266   : > { %v3707_v43 = vpop.f32.mrb[42].mxu0 }
 0x267   : > { %v3709_v34 = vpop.f32.mrb[43].mxu0 }
 0x26e   : > { %v3711_v51 = vpop.f32.mrb[44].mxu0 }
 0x26f   : > { %v3713_v38 = vpop.f32.mrb[45].mxu0 }
 0x276   : > { %v3715_v15 = vpop.f32.mrb[46].mxu0 }
 0x277   : > { %v3717_v1 = vpop.f32.mrb[47].mxu0 }
 0x27e   : > { %v3719_v5 = vpop.f32.mrb[48].mxu0 }
 0x27f   : > { %v3721_v11 = vpop.f32.mrb[49].mxu0 }
 0x286   : > { %v3723_v20 = vpop.f32.mrb[50].mxu0 }
 0x287   : > { %v3725_v49 = vpop.f32.mrb[51].mxu0 }
 0x28e   : > { %v3727_v26 = vpop.f32.mrb[52].mxu0 }
 0x28f   : > { %v3729_v52 = vpop.f32.mrb[53].mxu0 }
 0x296   : > { %v3731_v6 = vpop.f32.mrb[54].mxu0 }
 0x297   : > { %v3733_v42 = vpop.f32.mrb[55].mxu0 }
 0x29e   : > { %v3735_v57 = vpop.f32.mrb[56].mxu0 }
 0x29f   : > { %v3737_v7 = vpop.f32.mrb[57].mxu0 }
 0x2a6   : > { %v3739_v44 = vpop.f32.mrb[58].mxu0 }
 0x2a7   : > { %v3741_v16 = vpop.f32.mrb[59].mxu0 }
 0x2ae   : > { %v3743_v0 = vpop.f32.mrb[60].mxu0 }
 0x2af   : > { %v3745_v19 = vpop.f32.mrb[61].mxu0 }
 0x2b2   : > { %v2677_v14 = vpop.f32.mrb[0].mxu1 }
 0x2b3   : > { %v2723_v24 = vadd.f32 %v2677_v14, %v2577_v59  ;;  %v1865_v35 = vpop.f32.mrb[1].mxu1  ;;  %v2802_v59 = vld [vmem:[%s2890_s25 + $0x28] sm:$0xff] }
 0x2b4   : > { %v2724_v48 = vadd.f32 %v1865_v35, %v1404_v3 }
 0x2b5   : > { %v2064_v33 = vadd.f32 %v2723_v24, %v3750_v32 }
 0x2b6   : > { %v2063_v36 = vadd.f32 %v2724_v48, %v3750_v32  ;;  %v3754_v23 = vpop.f32.mrb[62].mxu0  ;;  %v2680_v8 = vpop.f32.mrb[2].mxu1 }
 0x2b7   : > { %v2096_v25 = vadd.f32 %v2798_v9, %v2064_v33  ;;  %v2725_v62 = vadd.f32 %v2680_v8, %v2580_v54  ;;  %v3757_v58 = vpop.f32.mrb[63].mxu0  ;;  %v1875_v56 = vpop.f32.mrb[3].mxu1 }
 0x2b8   : > { %v2095_v2 = vadd.f32 %v2799_v18, %v2063_v36  ;;  %v2726_v21 = vadd.f32 %v1875_v56, %v1414_v30 }
 0x2b9   : > { %v2128_v29 = vmax.f32 %v2096_v25, 0.0  ;;  %v2066_v50 = vadd.f32 %v2725_v62, %v3750_v32 }
 0x2ba   : > { %v2127_v12 = vmax.f32 %v2095_v2, 0.0  ;;  %v2065_v4 = vadd.f32 %v2726_v21, %v3750_v32  ;;  %v2683_v61 = vpop.f32.mrb[4].mxu1 }
 0x2bb   : > { %2160 = vst.msk [vmem:[%s3764_s15 + $0x8] sm:$0xff] %vm265_vm1, %v2128_v29  ;;  %v2098_v40 = vadd.f32 %v2800_v10, %v2066_v50  ;;  %v2727_v45 = vadd.f32 %v2683_v61, %v2583_v37  ;;  %v1885_v63 = vpop.f32.mrb[5].mxu1  ;;  %v2803_v37 = vld [vmem:[%s2890_s25 + $0x20] sm:$0xff] }
 0x2bc   : > { %2159 = vst.msk [vmem:[%s3764_s15] sm:$0xff] %vm265_vm1, %v2127_v12  ;;  %v2097_v41 = vadd.f32 %v2801_v46, %v2065_v4  ;;  %v2728_v13 = vadd.f32 %v1885_v63, %v1424_v39 }
 0x2bd   : > { %v2130_v17 = vmax.f32 %v2098_v40, 0.0  ;;  %v2068_v27 = vadd.f32 %v2727_v45, %v3750_v32 }
 0x2be   : > { %v2129_v55 = vmax.f32 %v2097_v41, 0.0  ;;  %v2067_v60 = vadd.f32 %v2728_v13, %v3750_v32  ;;  %v2686_v28 = vpop.f32.mrb[6].mxu1 }
 0x2bf   : > { %2162 = vst.msk [vmem:[%s3764_s15 + $0x18] sm:$0xff] %vm265_vm1, %v2130_v17  ;;  %v2100_v3 = vadd.f32 %v2802_v59, %v2068_v27  ;;  %v2729_v54 = vadd.f32 %v2686_v28, %v3699_v22  ;;  %v1895_v30 = vpop.f32.mrb[7].mxu1  ;;  %v2804_v22 = vld [vmem:[%s2890_s25 + $0x38] sm:$0xff] }
 0x2c0   : > { %2161 = vst.msk [vmem:[%s3764_s15 + $0x10] sm:$0xff] %vm265_vm1, %v2129_v55  ;;  %v2099_v39 = vadd.f32 %v2803_v37, %v2067_v60  ;;  %v2730_v14 = vadd.f32 %v1895_v30, %v3701_v53  ;;  %v2805_v53 = vld [vmem:[%s2890_s25 + $0x30] sm:$0xff] }
 0x2c1   : > { %v2132_v24 = vmax.f32 %v2100_v3, 0.0  ;;  %v2070_v35 = vadd.f32 %v2729_v54, %v3750_v32 }
 0x2c2   : > { %v2131_v48 = vmax.f32 %v2099_v39, 0.0  ;;  %v2069_v33 = vadd.f32 %v2730_v14, %v3750_v32  ;;  %v2689_v36 = vpop.f32.mrb[8].mxu1 }
 0x2c3   : > { %2164 = vst.msk [vmem:[%s3764_s15 + $0x28] sm:$0xff] %vm265_vm1, %v2132_v24  ;;  %v2102_v8 = vadd.f32 %v2804_v22, %v2070_v35  ;;  %v2731_v9 = vadd.f32 %v2689_v36, %v3703_v47  ;;  %v1905_v25 = vpop.f32.mrb[9].mxu1  ;;  %v2806_v47 = vld [vmem:[%s2890_s25 + $0x48] sm:$0xff] }
 0x2c4   : > { %2163 = vst.msk [vmem:[%s3764_s15 + $0x20] sm:$0xff] %vm265_vm1, %v2131_v48  ;;  %v2101_v62 = vadd.f32 %v2805_v53, %v2069_v33  ;;  %v2732_v56 = vadd.f32 %v1905_v25, %v3705_v31  ;;  %v2807_v31 = vld [vmem:[%s2890_s25 + $0x40] sm:$0xff] }
 0x2c5   : > { %v2134_v18 = vmax.f32 %v2102_v8, 0.0  ;;  %v2072_v2 = vadd.f32 %v2731_v9, %v3750_v32 }
 0x2c6   : > { %v2133_v21 = vmax.f32 %v2101_v62, 0.0  ;;  %v2071_v29 = vadd.f32 %v2732_v56, %v3750_v32  ;;  %v2692_v50 = vpop.f32.mrb[10].mxu1 }
 0x2c7   : > { %2166 = vst.msk [vmem:[%s3764_s15 + $0x38] sm:$0xff] %vm265_vm1, %v2134_v18  ;;  %v2104_v12 = vadd.f32 %v2806_v47, %v2072_v2  ;;  %v2733_v4 = vadd.f32 %v2692_v50, %v3707_v43  ;;  %v1915_v61 = vpop.f32.mrb[11].mxu1  ;;  %v2808_v43 = vld [vmem:[%s2890_s25 + $0x58] sm:$0xff] }
 0x2c8   : > { %2165 = vst.msk [vmem:[%s3764_s15 + $0x30] sm:$0xff] %vm265_vm1, %v2133_v21  ;;  %v2103_v10 = vadd.f32 %v2807_v31, %v2071_v29  ;;  %v2734_v40 = vadd.f32 %v1915_v61, %v3709_v34  ;;  %v2809_v34 = vld [vmem:[%s2890_s25 + $0x50] sm:$0xff] }
 0x2c9   : > { %v2136_v45 = vmax.f32 %v2104_v12, 0.0  ;;  %v2074_v63 = vadd.f32 %v2733_v4, %v3750_v32 }
 0x2ca   : > { %v2135_v46 = vmax.f32 %v2103_v10, 0.0  ;;  %v2073_v41 = vadd.f32 %v2734_v40, %v3750_v32  ;;  %v2695_v13 = vpop.f32.mrb[12].mxu1 }
 0x2cb   : > { %2168 = vst.msk [vmem:[%s3764_s15 + $0x48] sm:$0xff] %vm265_vm1, %v2136_v45  ;;  %v2106_v17 = vadd.f32 %v2808_v43, %v2074_v63  ;;  %v2735_v27 = vadd.f32 %v2695_v13, %v3711_v51  ;;  %v1925_v55 = vpop.f32.mrb[13].mxu1  ;;  %v2810_v51 = vld [vmem:[%s2890_s25 + $0x68] sm:$0xff] }
 0x2cc   : > { %2167 = vst.msk [vmem:[%s3764_s15 + $0x40] sm:$0xff] %vm265_vm1, %v2135_v46  ;;  %v2105_v60 = vadd.f32 %v2809_v34, %v2073_v41  ;;  %v2736_v28 = vadd.f32 %v1925_v55, %v3713_v38  ;;  %v2811_v38 = vld [vmem:[%s2890_s25 + $0x60] sm:$0xff] }
 0x2cd   : > { %v2138_v59 = vmax.f32 %v2106_v17, 0.0  ;;  %v2076_v3 = vadd.f32 %v2735_v27, %v3750_v32 }
 0x2ce   : > { %v2137_v54 = vmax.f32 %v2105_v60, 0.0  ;;  %v2075_v30 = vadd.f32 %v2736_v28, %v3750_v32  ;;  %v2698_v37 = vpop.f32.mrb[14].mxu1 }
 0x2cf   : > { %2170 = vst.msk [vmem:[%s3764_s15 + $0x58] sm:$0xff] %vm265_vm1, %v2138_v59  ;;  %v2108_v39 = vadd.f32 %v2810_v51, %v2076_v3  ;;  %v2737_v14 = vadd.f32 %v2698_v37, %v3715_v15  ;;  %v1935_v24 = vpop.f32.mrb[15].mxu1  ;;  %v2812_v15 = vld [vmem:[%s2890_s25 + $0x78] sm:$0xff] }
 0x2d0   : > { %2169 = vst.msk [vmem:[%s3764_s15 + $0x50] sm:$0xff] %vm265_vm1, %v2137_v54  ;;  %v2107_v35 = vadd.f32 %v2811_v38, %v2075_v30  ;;  %v2738_v48 = vadd.f32 %v1935_v24, %v3717_v1  ;;  %v2813_v1 = vld [vmem:[%s2890_s25 + $0x70] sm:$0xff] }
 0x2d1   : > { %v2140_v33 = vmax.f32 %v2108_v39, 0.0  ;;  %v2078_v36 = vadd.f32 %v2737_v14, %v3750_v32 }
 0x2d2   : > { %v2139_v22 = vmax.f32 %v2107_v35, 0.0  ;;  %v2077_v8 = vadd.f32 %v2738_v48, %v3750_v32  ;;  %v2701_v9 = vpop.f32.mrb[16].mxu1 }
 0x2d3   : > { %2172 = vst.msk [vmem:[%s3764_s15 + $0x68] sm:$0xff] %vm265_vm1, %v2140_v33  ;;  %v2110_v25 = vadd.f32 %v2812_v15, %v2078_v36  ;;  %v2739_v53 = vadd.f32 %v2701_v9, %v3719_v5  ;;  %v1945_v62 = vpop.f32.mrb[17].mxu1  ;;  %v2814_v5 = vld [vmem:[%s2890_s25 + $0x88] sm:$0xff] }
 0x2d4   : > { %2171 = vst.msk [vmem:[%s3764_s15 + $0x60] sm:$0xff] %vm265_vm1, %v2139_v22  ;;  %v2109_v56 = vadd.f32 %v2813_v1, %v2077_v8  ;;  %v2740_v18 = vadd.f32 %v1945_v62, %v3721_v11  ;;  %v2815_v11 = vld [vmem:[%s2890_s25 + $0x80] sm:$0xff] }
 0x2d5   : > { %v2142_v2 = vmax.f32 %v2110_v25, 0.0  ;;  %v2080_v21 = vadd.f32 %v2739_v53, %v3750_v32 }
 0x2d6   : > { %v2141_v29 = vmax.f32 %v2109_v56, 0.0  ;;  %v2079_v50 = vadd.f32 %v2740_v18, %v3750_v32  ;;  %v2704_v47 = vpop.f32.mrb[18].mxu1 }
 0x2d7   : > { %2174 = vst.msk [vmem:[%s3764_s15 + $0x78] sm:$0xff] %vm265_vm1, %v2142_v2  ;;  %v2112_v12 = vadd.f32 %v2814_v5, %v2080_v21  ;;  %v2741_v4 = vadd.f32 %v2704_v47, %v3723_v20  ;;  %v1955_v61 = vpop.f32.mrb[19].mxu1  ;;  %v2816_v20 = vld [vmem:[%s2890_s25 + $0x98] sm:$0xff] }
 0x2d8   : > { %2173 = vst.msk [vmem:[%s3764_s15 + $0x70] sm:$0xff] %vm265_vm1, %v2141_v29  ;;  %v2111_v31 = vadd.f32 %v2815_v11, %v2079_v50  ;;  %v2742_v10 = vadd.f32 %v1955_v61, %v3725_v49  ;;  %v2817_v49 = vld [vmem:[%s2890_s25 + $0x90] sm:$0xff] }
 0x2d9   : > { %v2144_v40 = vmax.f32 %v2112_v12, 0.0  ;;  %v2082_v45 = vadd.f32 %v2741_v4, %v3750_v32 }
 0x2da   : > { %v2143_v63 = vmax.f32 %v2111_v31, 0.0  ;;  %v2081_v46 = vadd.f32 %v2742_v10, %v3750_v32  ;;  %v2707_v41 = vpop.f32.mrb[20].mxu1 }
 0x2db   : > { %2176 = vst.msk [vmem:[%s3764_s15 + $0x88] sm:$0xff] %vm265_vm1, %v2144_v40  ;;  %v2114_v13 = vadd.f32 %v2816_v20, %v2082_v45  ;;  %v2743_v43 = vadd.f32 %v2707_v41, %v3727_v26  ;;  %v1965_v17 = vpop.f32.mrb[21].mxu1  ;;  %v2818_v26 = vld [vmem:[%s2890_s25 + $0xa8] sm:$0xff] }
 0x2dc   : > { %2175 = vst.msk [vmem:[%s3764_s15 + $0x80] sm:$0xff] %vm265_vm1, %v2143_v63  ;;  %v2113_v27 = vadd.f32 %v2817_v49, %v2081_v46  ;;  %v2744_v55 = vadd.f32 %v1965_v17, %v3729_v52  ;;  %v2819_v52 = vld [vmem:[%s2890_s25 + $0xa0] sm:$0xff] }
 0x2dd   : > { %v2146_v34 = vmax.f32 %v2114_v13, 0.0  ;;  %v2084_v60 = vadd.f32 %v2743_v43, %v3750_v32 }
 0x2de   : > { %v2145_v28 = vmax.f32 %v2113_v27, 0.0  ;;  %v2083_v59 = vadd.f32 %v2744_v55, %v3750_v32  ;;  %v2710_v3 = vpop.f32.mrb[22].mxu1 }
 0x2df   : > { %2178 = vst.msk [vmem:[%s3764_s15 + $0x98] sm:$0xff] %vm265_vm1, %v2146_v34  ;;  %v2116_v54 = vadd.f32 %v2818_v26, %v2084_v60  ;;  %v2745_v30 = vadd.f32 %v2710_v3, %v3731_v6  ;;  %v1975_v37 = vpop.f32.mrb[23].mxu1  ;;  %v2820_v6 = vld [vmem:[%s2890_s25 + $0xb8] sm:$0xff] }
 0x2e0   : > { %2177 = vst.msk [vmem:[%s3764_s15 + $0x90] sm:$0xff] %vm265_vm1, %v2145_v28  ;;  %v2115_v51 = vadd.f32 %v2819_v52, %v2083_v59  ;;  %v2746_v39 = vadd.f32 %v1975_v37, %v3733_v42  ;;  %v2821_v42 = vld [vmem:[%s2890_s25 + $0xb0] sm:$0xff]  ;;  %v2828_v59 = vld [vmem:[%s2890_s25 + $0xf8] sm:$0xff] }
 0x2e1   : > { %v2148_v14 = vmax.f32 %v2116_v54, 0.0  ;;  %v2086_v24 = vadd.f32 %v2745_v30, %v3750_v32 }
 0x2e2   : > { %v2147_v38 = vmax.f32 %v2115_v51, 0.0  ;;  %v2085_v35 = vadd.f32 %v2746_v39, %v3750_v32  ;;  %v2713_v48 = vpop.f32.mrb[24].mxu1 }
 0x2e3   : > { %2180 = vst.msk [vmem:[%s3764_s15 + $0xa8] sm:$0xff] %vm265_vm1, %v2148_v14  ;;  %v2118_v33 = vadd.f32 %v2820_v6, %v2086_v24  ;;  %v2747_v36 = vadd.f32 %v2713_v48, %v3735_v57  ;;  %v1985_v22 = vpop.f32.mrb[25].mxu1  ;;  %v2822_v57 = vld [vmem:[%s2890_s25 + $0xc8] sm:$0xff] }
 0x2e4   : > { %2179 = vst.msk [vmem:[%s3764_s15 + $0xa0] sm:$0xff] %vm265_vm1, %v2147_v38  ;;  %v2117_v8 = vadd.f32 %v2821_v42, %v2085_v35  ;;  %v2748_v9 = vadd.f32 %v1985_v22, %v3737_v7  ;;  %v2823_v7 = vld [vmem:[%s2890_s25 + $0xc0] sm:$0xff] }
 0x2e5   : > { %v2150_v15 = vmax.f32 %v2118_v33, 0.0  ;;  %v2088_v25 = vadd.f32 %v2747_v36, %v3750_v32 }
 0x2e6   : > { %v2149_v53 = vmax.f32 %v2117_v8, 0.0  ;;  %v2087_v62 = vadd.f32 %v2748_v9, %v3750_v32  ;;  %v2716_v1 = vpop.f32.mrb[26].mxu1 }
 0x2e7   : > { %2182 = vst.msk [vmem:[%s3764_s15 + $0xb8] sm:$0xff] %vm265_vm1, %v2150_v15  ;;  %v2120_v56 = vadd.f32 %v2822_v57, %v2088_v25  ;;  %v2749_v18 = vadd.f32 %v2716_v1, %v3739_v44  ;;  %v1995_v2 = vpop.f32.mrb[27].mxu1  ;;  %v2824_v44 = vld [vmem:[%s2890_s25 + $0xd8] sm:$0xff] }
 0x2e8   : > { %2181 = vst.msk [vmem:[%s3764_s15 + $0xb0] sm:$0xff] %vm265_vm1, %v2149_v53  ;;  %v2119_v21 = vadd.f32 %v2823_v7, %v2087_v62  ;;  %v2750_v29 = vadd.f32 %v1995_v2, %v3741_v16  ;;  %v2825_v16 = vld [vmem:[%s2890_s25 + $0xd0] sm:$0xff] }
 0x2e9   : > { %v2152_v50 = vmax.f32 %v2120_v56, 0.0  ;;  %v2090_v47 = vadd.f32 %v2749_v18, %v3750_v32 }
 0x2ea   : > { %v2151_v5 = vmax.f32 %v2119_v21, 0.0  ;;  %v2089_v12 = vadd.f32 %v2750_v29, %v3750_v32  ;;  %v2719_v4 = vpop.f32.mrb[28].mxu1 }
 0x2eb   : > { %2184 = vst.msk [vmem:[%s3764_s15 + $0xc8] sm:$0xff] %vm265_vm1, %v2152_v50  ;;  %v2122_v61 = vadd.f32 %v2824_v44, %v2090_v47  ;;  %v2751_v11 = vadd.f32 %v2719_v4, %v3743_v0  ;;  %v2005_v31 = vpop.f32.mrb[29].mxu1  ;;  %v2826_v0 = vld [vmem:[%s2890_s25 + $0xe8] sm:$0xff] }
 0x2ec   : > { %2183 = vst.msk [vmem:[%s3764_s15 + $0xc0] sm:$0xff] %vm265_vm1, %v2151_v5  ;;  %v2121_v10 = vadd.f32 %v2825_v16, %v2089_v12  ;;  %v2752_v40 = vadd.f32 %v2005_v31, %v3745_v19  ;;  %v2827_v19 = vld [vmem:[%s2890_s25 + $0xe0] sm:$0xff] }
 0x2ed   : > { %v2154_v45 = vmax.f32 %v2122_v61, 0.0  ;;  %v2092_v63 = vadd.f32 %v2751_v11, %v3750_v32 }
 0x2ee   : > { %v2153_v46 = vmax.f32 %v2121_v10, 0.0  ;;  %v2091_v41 = vadd.f32 %v2752_v40, %v3750_v32  ;;  %v2722_v20 = vpop.f32.mrb[30].mxu1 }
 0x2ef   : > { %2186 = vst.msk [vmem:[%s3764_s15 + $0xd8] sm:$0xff] %vm265_vm1, %v2154_v45  ;;  %v2124_v13 = vadd.f32 %v2826_v0, %v2092_v63  ;;  %v2753_v43 = vadd.f32 %v2722_v20, %v3754_v23  ;;  %v2015_v17 = vpop.f32.mrb[31].mxu1  ;;  %v2829_v23 = vld [vmem:[%s2890_s25 + $0xf0] sm:$0xff] }
 0x2f0   : > { %2185 = vst.msk [vmem:[%s3764_s15 + $0xd0] sm:$0xff] %vm265_vm1, %v2153_v46  ;;  %v2123_v49 = vadd.f32 %v2827_v19, %v2091_v41  ;;  %v2754_v27 = vadd.f32 %v2015_v17, %v3757_v58 }
 0x2f1   : > { %v2156_v55 = vmax.f32 %v2124_v13, 0.0  ;;  %v2094_v34 = vadd.f32 %v2753_v43, %v3750_v32 }
 0x2f2   : > { %v2155_v60 = vmax.f32 %v2123_v49, 0.0  ;;  %v2093_v28 = vadd.f32 %v2754_v27, %v3750_v32 }
 0x2f3   : > { %2188 = vst.msk [vmem:[%s3764_s15 + $0xe8] sm:$0xff] %vm265_vm1, %v2156_v55  ;;  %v2126_v3 = vadd.f32 %v2828_v59, %v2094_v34 }
 0x2f4   : > { %2187 = vst.msk [vmem:[%s3764_s15 + $0xe0] sm:$0xff] %vm265_vm1, %v2155_v60  ;;  %v2125_v26 = vadd.f32 %v2829_v23, %v2093_v28 }
 0x2f5   : > { %v2158_v54 = vmax.f32 %v2126_v3, 0.0 }
 0x2f6   : > { %v2157_v30 = vmax.f32 %v2125_v26, 0.0 }
 0x2f7   : > { %2190 = vst.msk [vmem:[%s3764_s15 + $0xf8] sm:$0xff] %vm265_vm1, %v2158_v54 }
 0x2f8   : > { %2189 = vst.msk [vmem:[%s3764_s15 + $0xf0] sm:$0xff] %vm265_vm1, %v2157_v30 }
 0x2f9 PF: > { %s15_s18 = sadd.s32 1, %s2836_s18  }
 0x2fa   : > { %p12_p4 = scmp.ge.s32.totalorder %s15_s18, 4  }
 0x2fc   :  { %14 = sbr.rel (!%p12_p4) target bundleno = 1 (0x1), region = 72 }

</bundles_post_ra>
